<compile_context>
chip_gen: v6e
topology: v6e:2x2x1
jax: 0.10.0
libtpu: 0.0.40
codegen_flags: <defaults>
</compile_context>

<pallas_src>
import math
from functools import partial

import jax
import jax.numpy as jnp
from jax import lax
from jax.experimental import pallas as pl
from jax.experimental.pallas import tpu as pltpu


def make_pos_embedding(maxlen, emb_size):
    """Same recipe as PositionalEncoding.__init__ -> (maxlen, emb_size)."""
    den = jnp.exp(
        -jnp.arange(0, emb_size, 2, dtype=jnp.float32) * math.log(10000.0) / emb_size
    )
    pos = jnp.arange(0, maxlen, dtype=jnp.float32).reshape(maxlen, 1)
    pe = jnp.zeros((maxlen, emb_size), dtype=jnp.float32)
    pe = pe.at[:, 0::2].set(jnp.sin(pos * den))
    pe = pe.at[:, 1::2].set(jnp.cos(pos * den))
    return pe


def _layer_norm(x, g, b, eps=1e-5):
    mu = jnp.mean(x, axis=-1, keepdims=True)
    var = jnp.mean(jnp.square(x - mu), axis=-1, keepdims=True)
    return (x - mu) * lax.rsqrt(var + eps) * g + b


def sensor_encoder_kernel(x_ref, sc_ref, pos_ref, w_in_ref, w_p_ref, svec_ref,
                          wqkv_ref, wo_ref, w1_ref, w2_ref, lvec_ref,
                          out_ref, h_ref,
                          *, nhead, bt, weights_resident, mxu_dtype):
    """One grid step = (one batch tile of bt elements, one layer); h_ref is the carry."""
    l = pl.program_id(1)
    n_layers = pl.num_programs(1)
    wl = l if weights_resident else 0           # resident: index layer inside the kernel

    R, D = h_ref.shape                          # R = bt * S rows
    S = R // bt
    hd = D // nhead
    dff = w1_ref.shape[-1]                      # FFN hidden width

    def mm(a, w):
        # MXU matmul; operands in mxu_dtype (bf16 by default), f32 accumulation.
        return jnp.dot(a.astype(mxu_dtype), w.astype(mxu_dtype),
                       preferred_element_type=jnp.float32)

    # ---- embedding: linear_in + ScaleEncoding + PositionalEncoding (layer 0 only) ----
    @pl.when(l == 0)
    def _embed():
        x = x_ref[...]                          # (R, d_in)
        sc = sc_ref[...]                        # (R, 2)
        sv = svec_ref[...]                      # (8, D): b_in, b_sc, b_p, w_sc0, w_sc1
        h0 = mm(x, w_in_ref[...]) + sv[0:1, :]
        # ScaleEncoding (R,2)@(2,D) replaced by two VPU broadcast FMAs.
        h0 = h0 + sc[:, 0:1] * sv[3:4, :] + sc[:, 1:2] * sv[4:5, :] + sv[1:2, :]
        h_ref[...] = h0 + pos_ref[...]          # pos pre-tiled to (R, D)

    # ---------------------- transformer encoder layer l (post-norm) -------------------
    h = h_ref[...]                              # (R, D) f32
    lv = lvec_ref[wl]                           # (8, W) packed per-layer vectors (f32)
    bqkv = lv[0:1, 0:3 * D]                     # Q part already scaled by 1/sqrt(hd)
    bo = lv[1:2, 0:D]
    ln1g, ln1b = lv[2:3, 0:D], lv[3:4, 0:D]
    b1 = lv[4:5, 0:dff]
    b2 = lv[5:6, 0:D]
    ln2g, ln2b = lv[6:7, 0:D], lv[7:8, 0:D]

    wqkv = wqkv_ref[wl]                         # (D, 3D)
    wo = wo_ref[wl]                             # (D, D)
    w1 = w1_ref[wl]                             # (D, dff)
    w2 = w2_ref[wl]                             # (dff, D)

    qkv = mm(h, wqkv) + bqkv                    # (R, 3D), Q columns pre-scaled

    # Per-batch, per-head attention; out-projection accumulated per head (no concat).
    rows = []
    for b in range(bt):                         # unrolled at trace time
        r0 = b * S
        a_b = jnp.zeros((S, D), jnp.float32)
        for hh in range(nhead):
            c0 = hh * hd
            q_b = qkv[r0:r0 + S, c0:c0 + hd]
            k_b = qkv[r0:r0 + S, D + c0:D + c0 + hd]
            v_b = qkv[r0:r0 + S, 2 * D + c0:2 * D + c0 + hd]
            # q @ k^T via dot_general contracting last dims (no explicit transpose).
            s = lax.dot_general(q_b.astype(mxu_dtype), k_b.astype(mxu_dtype),
                                (((1,), (1,)), ((), ())),
                                preferred_element_type=jnp.float32)      # (S, S)
            s = s - jnp.max(s, axis=-1, keepdims=True)
            p = jnp.exp(s)
            p = p * pl.reciprocal(jnp.sum(p, axis=-1, keepdims=True), approx=True)
            head = mm(p, v_b)                                            # (S, hd)
            a_b = a_b + mm(head, wo[c0:c0 + hd, :])                      # accumulate out-proj
        rows.append(a_b)
    a = rows[0] if bt == 1 else jnp.concatenate(rows, axis=0)            # (R, D)
    h = _layer_norm(h + a + bo, ln1g, ln1b)

    f = jnp.maximum(mm(h, w1) + b1, 0.0)
    f = mm(f, w2) + b2
    h = _layer_norm(h + f, ln2g, ln2b)
    h_ref[...] = h

    # ----------------------- mean-pool over S + final projection ----------------------
    @pl.when(l == n_layers - 1)
    def _finalize():
        pooled = jnp.mean(h.reshape(bt, S, D), axis=1)                   # (bt, D)
        out = mm(pooled, w_p_ref[...]) + svec_ref[2:3, :]                # + b_p
        out_ref[...] = out.astype(out_ref.dtype)


def _pick_batch_tile(B, S, target_rows=256):
    """bt batch elements per grid step so matmuls have ~128-256 rows (v5e/v6e MXU fill)."""
    if B * S <= target_rows:
        return B
    cands = [bt for bt in range(8, B, 8) if B % bt == 0 and bt * S <= target_rows]
    return max(cands) if cands else B
    # NOTE(v7x): with 2 TensorCores sharding the "parallel" batch axis, prefer a bt
    # that keeps B // bt >= 2 and even when B is large enough.


def sensor_encoder_forward(x, scale, params, *, nhead, nlayers, seq_len=64,
                           mxu_dtype=jnp.bfloat16, batch_tile=None,
                           weights_resident=None):
    """x: (S, B, d_in), scale: (S, B, 2) -> (B, d_model)."""
    S, B, d_in = x.shape
    D = params["w_in"].shape[1]
    dff = params["w1"].shape[2]
    L = nlayers
    hd = D // nhead
    assert S <= seq_len, "sequence longer than positional-encoding table"
    assert D % nhead == 0

    bt = _pick_batch_tile(B, S) if batch_tile is None else batch_tile
    assert B % bt == 0

    # Fold 1/sqrt(hd) into the Q columns of wqkv / bqkv (removes per-head scaling).
    qscale = jnp.concatenate([jnp.full((D,), 1.0 / math.sqrt(hd), jnp.float32),
                              jnp.ones((2 * D,), jnp.float32)])
    wqkv_f = params["wqkv"] * qscale
    bqkv_f = params["bqkv"] * qscale

    # Pack per-layer small vectors into one (L, 8, W) array (row layout documented in kernel).
    W = max(3 * D, dff)
    W = -(-W // 128) * 128

    def _row(v):
        return jnp.pad(v.astype(jnp.float32), ((0, 0), (0, 0), (0, W - v.shape[-1])))

    lvec = jnp.concatenate(
        [_row(bqkv_f), _row(params["bo"]),
         _row(params["ln1_g"]), _row(params["ln1_b"]),
         _row(params["b1"]), _row(params["b2"]),
         _row(params["ln2_g"]), _row(params["ln2_b"])], axis=1)        # (L, 8, W)

    # Shared small vectors packed into one (8, D) array: b_in, b_sc, b_p, w_sc rows.
    svec = jnp.concatenate(
        [params["b_in"], params["b_sc"], params["b_p"], params["w_sc"],
         jnp.zeros((3, D), jnp.float32)], axis=0)                      # (8, D)

    pos = make_pos_embedding(seq_len, D)[:S]                           # (S, D)
    pos_t = jnp.tile(pos, (bt, 1))                                     # (bt*S, D)

    # Only MXU matmul weight matrices are cast; biases / LN / softmax math stay f32.
    cast = lambda a: a.astype(mxu_dtype)
    w_in, w_p = cast(params["w_in"]), cast(params["w_p"])
    wqkv, wo = cast(wqkv_f), cast(params["wo"])
    w1, w2 = cast(params["w1"]), cast(params["w2"])

    if weights_resident is None:
        layer_bytes = sum(int(a.size) * a.dtype.itemsize for a in (wqkv, wo, w1, w2, lvec))
        # Keep resident weights (2x-buffered) comfortably inside v7x's 64 MiB VMEM.
        weights_resident = layer_bytes <= (16 << 20)

    x_bm = jnp.transpose(x, (1, 0, 2)).reshape(B * S, d_in)            # batch-major rows
    sc_bm = jnp.transpose(scale, (1, 0, 2)).reshape(B * S, 2)

    args = [x_bm, sc_bm, pos_t, w_in, w_p, svec, wqkv, wo, w1, w2, lvec]

    def const_spec(shape):
        return pl.BlockSpec(shape, lambda bi, l, _n=len(shape): (0,) * _n)

    def layer_spec(full_shape):
        if weights_resident:
            return const_spec(full_shape)      # DMA'd once, VMEM-resident for whole grid
        return pl.BlockSpec((1,) + full_shape[1:], lambda bi, l: (l, 0, 0))

    in_specs = [
        pl.BlockSpec((bt * S, d_in), lambda bi, l: (bi, 0)),           # x
        pl.BlockSpec((bt * S, 2), lambda bi, l: (bi, 0)),              # scale
        const_spec((bt * S, D)),                                       # pos (pre-tiled)
        const_spec((d_in, D)),                                         # w_in
        const_spec((D, D)),                                            # w_p
        const_spec((8, D)),                                            # svec
        layer_spec((L, D, 3 * D)),                                     # wqkv
        layer_spec((L, D, D)),                                         # wo
        layer_spec((L, D, dff)),                                       # w1
        layer_spec((L, dff, D)),                                       # w2
        layer_spec((L, 8, W)),                                         # lvec
    ]
    out_spec = pl.BlockSpec((bt, D), lambda bi, l: (bi, 0))

    # VMEM budget from the actual (post-cast) block sizes; 2x for double-buffering.
    def blk_bytes(shape, dtype):
        n = 1
        for s in shape:
            n *= int(s)
        return n * jnp.dtype(dtype).itemsize

    fixed = [((bt * S, d_in), x_bm.dtype), ((bt * S, 2), sc_bm.dtype),
             ((bt * S, D), pos_t.dtype), ((d_in, D), w_in.dtype),
             ((D, D), w_p.dtype), ((8, D), svec.dtype)]
    lay = [((L, D, 3 * D), wqkv.dtype), ((L, D, D), wo.dtype),
           ((L, D, dff), w1.dtype), ((L, dff, D), w2.dtype), ((L, 8, W), lvec.dtype)]
    vmem = sum(2 * blk_bytes(s, d) for s, d in fixed)
    for s, d in lay:
        vmem += 2 * blk_bytes(s if weights_resident else (1,) + s[1:], d)
    vmem += 2 * blk_bytes((bt, D), jnp.float32)                        # out block
    vmem += blk_bytes((bt * S, D), jnp.float32)                        # h scratch
    vmem_limit = min(56 << 20, max(32 << 20, vmem + (8 << 20)))        # v7x-safe cap

    flops = int(B * (2 * S * d_in * D
                     + L * (2 * S * D * 3 * D + 4 * nhead * S * S * hd
                            + 2 * S * D * D + 4 * S * D * dff))
                + 2 * B * D * D)
    bytes_accessed = int(sum(int(a.size) * a.dtype.itemsize for a in args) + B * D * 4)
    cost = pl.CostEstimate(flops=flops,
                           transcendentals=int(B * L * nhead * S * S),
                           bytes_accessed=bytes_accessed)

    kernel = partial(sensor_encoder_kernel, nhead=nhead, bt=bt,
                     weights_resident=weights_resident, mxu_dtype=mxu_dtype)

    out = pl.pallas_call(
        kernel,
        out_shape=jax.ShapeDtypeStruct((B, D), jnp.float32),
        grid_spec=pltpu.PrefetchScalarGridSpec(
            num_scalar_prefetch=0,
            # Batch tiles outer/"parallel", layers inner/"arbitrary" — required for the
            # persistent h_ref carry; do not reorder.
            grid=(B // bt, nlayers),
            in_specs=in_specs,
            out_specs=out_spec,
            scratch_shapes=[pltpu.VMEM((bt * S, D), jnp.float32)],     # hidden-state carry
        ),
        compiler_params=pltpu.CompilerParams(
            dimension_semantics=("parallel", "arbitrary"),
            vmem_limit_bytes=vmem_limit,
        ),
        cost_estimate=cost,
    )(*args)
    return out


# ------------------------- pure-JAX reference (PyTorch semantics) -------------------------
def sensor_encoder_reference(x, scale, params, *, nhead, nlayers, seq_len=64):
    S, B, d_in = x.shape
    D = params["w_in"].shape[1]
    hd = D // nhead
    pos = make_pos_embedding(seq_len, D)[:S][:, None, :]               # (S, 1, D)

    def ln(t, g, b, eps=1e-5):
        mu = t.mean(-1, keepdims=True)
        var = ((t - mu) ** 2).mean(-1, keepdims=True)
        return (t - mu) / jnp.sqrt(var + eps) * g + b

    h = x @ params["w_in"] + params["b_in"]
    h = h + scale @ params["w_sc"] + params["b_sc"]
    h = h + pos
    for l in range(nlayers):
        qkv = h @ params["wqkv"][l] + params["bqkv"][l]                # (S, B, 3D)
        q, k, v = qkv[..., :D], qkv[..., D:2 * D], qkv[..., 2 * D:]

        def split(t):
            return jnp.transpose(t.reshape(S, B, nhead, hd), (1, 2, 0, 3))

        qh, kh, vh = split(q), split(k), split(v)
        s = jnp.einsum("bhqd,bhkd->bhqk", qh, kh) / math.sqrt(hd)
        p = jax.nn.softmax(s, axis=-1)
        a = jnp.einsum("bhqk,bhkd->bhqd", p, vh)
        a = jnp.transpose(a, (2, 0, 1, 3)).reshape(S, B, D)
        a = a @ params["wo"][l] + params["bo"][l]
        h = ln(h + a, params["ln1_g"][l], params["ln1_b"][l])
        f = jax.nn.relu(h @ params["w1"][l] + params["b1"][l])
        f = f @ params["w2"][l] + params["b2"][l]
        h = ln(h + f, params["ln2_g"][l], params["ln2_b"][l])
    pooled = jnp.transpose(h, (1, 0, 2)).mean(axis=1)                  # (B, D)
    return pooled @ params["w_p"] + params["b_p"]


def init_params(key, d_in, d_model, nhead, d_hid, nlayers):
    """Deterministic synthetic init mirroring _init_weights (std≈0.02, zero bias, LN=1/0)."""
    D, Hd, L = d_model, d_hid, nlayers
    ks = jax.random.split(key, 7)

    def w(k, shape):
        return (0.02 * jax.random.normal(k, shape)).astype(jnp.float32)

    return {
        "w_in": w(ks[0], (d_in, D)), "b_in": jnp.zeros((1, D), jnp.float32),
        "w_sc": w(ks[1], (2, D)),    "b_sc": jnp.zeros((1, D), jnp.float32),
        "wqkv": w(ks[2], (L, D, 3 * D)), "bqkv": jnp.zeros((L, 1, 3 * D), jnp.float32),
        "wo":   w(ks[3], (L, D, D)),     "bo":   jnp.zeros((L, 1, D), jnp.float32),
        "ln1_g": jnp.ones((L, 1, D), jnp.float32), "ln1_b": jnp.zeros((L, 1, D), jnp.float32),
        "w1": w(ks[4], (L, D, Hd)), "b1": jnp.zeros((L, 1, Hd), jnp.float32),
        "w2": w(ks[5], (L, Hd, D)), "b2": jnp.zeros((L, 1, D), jnp.float32),
        "ln2_g": jnp.ones((L, 1, D), jnp.float32), "ln2_b": jnp.zeros((L, 1, D), jnp.float32),
        "w_p": w(ks[6], (D, D)), "b_p": jnp.zeros((1, D), jnp.float32),
    }


if __name__ == "__main__":
    # Small shapes consistent with the module: x (S, B, d_in), scale (S, B, 2)
    S, B = 8, 2
    D_IN, D_MODEL, NHEAD, D_HID, NLAYERS = 16, 128, 4, 128, 2
    SEQ_LEN = 64  # maxlen for the positional-encoding table

    key = jax.random.PRNGKey(0)
    kx, ks, kp = jax.random.split(key, 3)
    x = jax.random.normal(kx, (S, B, D_IN), dtype=jnp.float32)
    scale = jax.random.normal(ks, (S, B, 2), dtype=jnp.float32)
    params = init_params(kp, D_IN, D_MODEL, NHEAD, D_HID, NLAYERS)

    ref = jax.block_until_ready(
        sensor_encoder_reference(x, scale, params,
                                 nhead=NHEAD, nlayers=NLAYERS, seq_len=SEQ_LEN))

    # Default path: bf16 MXU operands + VMEM-resident layer weights + batch tiling.
    out = jax.block_until_ready(
        sensor_encoder_forward(x, scale, params,
                               nhead=NHEAD, nlayers=NLAYERS, seq_len=SEQ_LEN))
    assert out.shape == (B, D_MODEL), out.shape
    assert float(jnp.max(jnp.abs(out - ref))) < 5e-2, (
        float(jnp.max(jnp.abs(out - ref))))

    # f32 MXU operands + per-layer streamed weights (fallback path): tight check.
    out_f32 = jax.block_until_ready(
        sensor_encoder_forward(x, scale, params,
                               nhead=NHEAD, nlayers=NLAYERS, seq_len=SEQ_LEN,
                               mxu_dtype=jnp.float32, weights_resident=False))
    assert jnp.allclose(out_f32, ref, atol=2e-3, rtol=2e-3), (
        float(jnp.max(jnp.abs(out_f32 - ref))))

    print("KERNEL_OK")
</pallas_src>

<mosaic_0001>
module attributes {stable_mosaic.version = 11 : i64} {
  func.func @sensor_encoder_kernel(%arg0: i32, %arg1: i32, %arg2: memref<16x16xf32, #tpu.memory_space<vmem>>, %arg3: memref<16x2xf32, #tpu.memory_space<vmem>>, %arg4: memref<16x128xf32, #tpu.memory_space<vmem>>, %arg5: memref<16x128xbf16, #tpu.memory_space<vmem>>, %arg6: memref<128x128xbf16, #tpu.memory_space<vmem>>, %arg7: memref<8x128xf32, #tpu.memory_space<vmem>>, %arg8: memref<2x128x384xbf16, #tpu.memory_space<vmem>>, %arg9: memref<2x128x128xbf16, #tpu.memory_space<vmem>>, %arg10: memref<2x128x128xbf16, #tpu.memory_space<vmem>>, %arg11: memref<2x128x128xbf16, #tpu.memory_space<vmem>>, %arg12: memref<2x8x384xf32, #tpu.memory_space<vmem>>, %arg13: memref<2x128xf32, #tpu.memory_space<vmem>>, %arg14: memref<16x128xf32, #tpu.memory_space<vmem>>) attributes {dimension_semantics = [#tpu.dimension_semantics<parallel>, #tpu.dimension_semantics<arbitrary>], iteration_bounds = array<i64: 1, 2>, scalar_prefetch = 0 : i64, scratch_operands = 1 : i64, tpu.core_type = #tpu.core_type<tc>, window_params = [{transform_indices = @transform_0, window_bounds = array<i64: 16, 16>}, {transform_indices = @transform_1, window_bounds = array<i64: 16, 2>}, {pipeline_mode = #tpu.pipeline_mode<synchronous>, transform_indices = @transform_2, window_bounds = array<i64: 16, 128>}, {pipeline_mode = #tpu.pipeline_mode<synchronous>, transform_indices = @transform_3, window_bounds = array<i64: 16, 128>}, {pipeline_mode = #tpu.pipeline_mode<synchronous>, transform_indices = @transform_4, window_bounds = array<i64: 128, 128>}, {pipeline_mode = #tpu.pipeline_mode<synchronous>, transform_indices = @transform_5, window_bounds = array<i64: 8, 128>}, {pipeline_mode = #tpu.pipeline_mode<synchronous>, transform_indices = @transform_6, window_bounds = array<i64: 2, 128, 384>}, {pipeline_mode = #tpu.pipeline_mode<synchronous>, transform_indices = @transform_7, window_bounds = array<i64: 2, 128, 128>}, {pipeline_mode = #tpu.pipeline_mode<synchronous>, transform_indices = @transform_8, window_bounds = array<i64: 2, 128, 128>}, {pipeline_mode = #tpu.pipeline_mode<synchronous>, transform_indices = @transform_9, window_bounds = array<i64: 2, 128, 128>}, {pipeline_mode = #tpu.pipeline_mode<synchronous>, transform_indices = @transform_10, window_bounds = array<i64: 2, 8, 384>}, {transform_indices = @transform_11, window_bounds = array<i64: 2, 128>}]} {
    %c0_i32 = arith.constant 0 : i32
    %0 = arith.cmpi eq, %arg1, %c0_i32 : i32
    %1 = arith.extui %0 : i1 to i32
    %c0_i32_0 = arith.constant 0 : i32
    %2 = arith.cmpi ne, %1, %c0_i32_0 : i32
    scf.if %2 {
      %c0_70 = arith.constant 0 : index
      %c0_71 = arith.constant 0 : index
      %280 = vector.load %arg2[%c0_70, %c0_71] : memref<16x16xf32, #tpu.memory_space<vmem>>, vector<16x16xf32>
      %c0_72 = arith.constant 0 : index
      %c0_73 = arith.constant 0 : index
      %281 = vector.load %arg3[%c0_72, %c0_73] : memref<16x2xf32, #tpu.memory_space<vmem>>, vector<16x2xf32>
      %c0_74 = arith.constant 0 : index
      %c0_75 = arith.constant 0 : index
      %282 = vector.load %arg7[%c0_74, %c0_75] : memref<8x128xf32, #tpu.memory_space<vmem>>, vector<8x128xf32>
      %c0_76 = arith.constant 0 : index
      %c0_77 = arith.constant 0 : index
      %283 = vector.load %arg5[%c0_76, %c0_77] : memref<16x128xbf16, #tpu.memory_space<vmem>>, vector<16x128xbf16>
      %284 = arith.truncf %280 : vector<16x16xf32> to vector<16x16xbf16>
      %cst_78 = arith.constant dense<0.000000e+00> : vector<16x128xf32>
      %285 = tpu.matmul %284, %283, %cst_78 {dimension_numbers = #tpu.dot_dimension_numbers<[1], [0], [0], [1], [0, 0, 1, 1], [], []>} : vector<16x16xbf16>, vector<16x128xbf16>, vector<16x128xf32> -> vector<16x128xf32>
      %286 = vector.extract_strided_slice %282 {offsets = [0, 0], sizes = [1, 128], strides = [1, 1]} : vector<8x128xf32> to vector<1x128xf32>
      %287 = vector.broadcast %286 : vector<1x128xf32> to vector<16x128xf32>
      %288 = arith.addf %285, %287 : vector<16x128xf32>
      %289 = vector.extract_strided_slice %281 {offsets = [0, 0], sizes = [16, 1], strides = [1, 1]} : vector<16x2xf32> to vector<16x1xf32>
      %290 = vector.extract_strided_slice %282 {offsets = [3, 0], sizes = [1, 128], strides = [1, 1]} : vector<8x128xf32> to vector<1x128xf32>
      %291 = vector.broadcast %289 : vector<16x1xf32> to vector<16x128xf32>
      %292 = vector.broadcast %290 : vector<1x128xf32> to vector<16x128xf32>
      %293 = arith.mulf %291, %292 : vector<16x128xf32>
      %294 = arith.addf %288, %293 : vector<16x128xf32>
      %295 = vector.extract_strided_slice %281 {offsets = [0, 1], sizes = [16, 1], strides = [1, 1]} : vector<16x2xf32> to vector<16x1xf32>
      %296 = vector.extract_strided_slice %282 {offsets = [4, 0], sizes = [1, 128], strides = [1, 1]} : vector<8x128xf32> to vector<1x128xf32>
      %297 = vector.broadcast %295 : vector<16x1xf32> to vector<16x128xf32>
      %298 = vector.broadcast %296 : vector<1x128xf32> to vector<16x128xf32>
      %299 = arith.mulf %297, %298 : vector<16x128xf32>
      %300 = arith.addf %294, %299 : vector<16x128xf32>
      %301 = vector.extract_strided_slice %282 {offsets = [1, 0], sizes = [1, 128], strides = [1, 1]} : vector<8x128xf32> to vector<1x128xf32>
      %302 = vector.broadcast %301 : vector<1x128xf32> to vector<16x128xf32>
      %303 = arith.addf %300, %302 : vector<16x128xf32>
      %c0_79 = arith.constant 0 : index
      %c0_80 = arith.constant 0 : index
      %304 = vector.load %arg4[%c0_79, %c0_80] : memref<16x128xf32, #tpu.memory_space<vmem>>, vector<16x128xf32>
      %305 = arith.addf %303, %304 : vector<16x128xf32>
      %c0_81 = arith.constant 0 : index
      %c0_82 = arith.constant 0 : index
      %306 = vector.load %arg14[%c0_81, %c0_82] : memref<16x128xf32, #tpu.memory_space<vmem>>, vector<16x128xf32>
      tpu.vector_store %arg14[%c0_81, %c0_82], %305 {strides = array<i32>} : memref<16x128xf32, #tpu.memory_space<vmem>>, vector<16x128xf32>,
    } else {
    }
    %c0 = arith.constant 0 : index
    %c0_1 = arith.constant 0 : index
    %3 = vector.load %arg14[%c0, %c0_1] : memref<16x128xf32, #tpu.memory_space<vmem>>, vector<16x128xf32>
    %4 = arith.index_cast %arg1 : i32 to index
    %c0_2 = arith.constant 0 : index
    %c0_3 = arith.constant 0 : index
    %5 = vector.load %arg12[%4, %c0_2, %c0_3] : memref<2x8x384xf32, #tpu.memory_space<vmem>>, vector<1x8x384xf32>
    %6 = vector.shape_cast %5 : vector<1x8x384xf32> to vector<8x384xf32>
    %7 = vector.extract_strided_slice %6 {offsets = [0, 0], sizes = [1, 384], strides = [1, 1]} : vector<8x384xf32> to vector<1x384xf32>
    %8 = vector.extract_strided_slice %6 {offsets = [1, 0], sizes = [1, 128], strides = [1, 1]} : vector<8x384xf32> to vector<1x128xf32>
    %9 = vector.extract_strided_slice %6 {offsets = [2, 0], sizes = [1, 128], strides = [1, 1]} : vector<8x384xf32> to vector<1x128xf32>
    %10 = vector.extract_strided_slice %6 {offsets = [3, 0], sizes = [1, 128], strides = [1, 1]} : vector<8x384xf32> to vector<1x128xf32>
    %11 = vector.extract_strided_slice %6 {offsets = [4, 0], sizes = [1, 128], strides = [1, 1]} : vector<8x384xf32> to vector<1x128xf32>
    %12 = vector.extract_strided_slice %6 {offsets = [5, 0], sizes = [1, 128], strides = [1, 1]} : vector<8x384xf32> to vector<1x128xf32>
    %13 = vector.extract_strided_slice %6 {offsets = [6, 0], sizes = [1, 128], strides = [1, 1]} : vector<8x384xf32> to vector<1x128xf32>
    %14 = vector.extract_strided_slice %6 {offsets = [7, 0], sizes = [1, 128], strides = [1, 1]} : vector<8x384xf32> to vector<1x128xf32>
    %15 = arith.index_cast %arg1 : i32 to index
    %c0_4 = arith.constant 0 : index
    %c0_5 = arith.constant 0 : index
    %16 = vector.load %arg8[%15, %c0_4, %c0_5] : memref<2x128x384xbf16, #tpu.memory_space<vmem>>, vector<1x128x384xbf16>
    %17 = vector.shape_cast %16 : vector<1x128x384xbf16> to vector<128x384xbf16>
    %18 = arith.index_cast %arg1 : i32 to index
    %c0_6 = arith.constant 0 : index
    %c0_7 = arith.constant 0 : index
    %19 = vector.load %arg9[%18, %c0_6, %c0_7] : memref<2x128x128xbf16, #tpu.memory_space<vmem>>, vector<1x128x128xbf16>
    %20 = vector.shape_cast %19 : vector<1x128x128xbf16> to vector<128x128xbf16>
    %21 = arith.index_cast %arg1 : i32 to index
    %c0_8 = arith.constant 0 : index
    %c0_9 = arith.constant 0 : index
    %22 = vector.load %arg10[%21, %c0_8, %c0_9] : memref<2x128x128xbf16, #tpu.memory_space<vmem>>, vector<1x128x128xbf16>
    %23 = vector.shape_cast %22 : vector<1x128x128xbf16> to vector<128x128xbf16>
    %24 = arith.index_cast %arg1 : i32 to index
    %c0_10 = arith.constant 0 : index
    %c0_11 = arith.constant 0 : index
    %25 = vector.load %arg11[%24, %c0_10, %c0_11] : memref<2x128x128xbf16, #tpu.memory_space<vmem>>, vector<1x128x128xbf16>
    %26 = vector.shape_cast %25 : vector<1x128x128xbf16> to vector<128x128xbf16>
    %27 = arith.truncf %3 : vector<16x128xf32> to vector<16x128xbf16>
    %cst = arith.constant dense<0.000000e+00> : vector<16x384xf32>
    %28 = tpu.matmul %27, %17, %cst {dimension_numbers = #tpu.dot_dimension_numbers<[1], [0], [0], [1], [0, 0, 1, 1], [], []>} : vector<16x128xbf16>, vector<128x384xbf16>, vector<16x384xf32> -> vector<16x384xf32>
    %29 = vector.broadcast %7 : vector<1x384xf32> to vector<16x384xf32>
    %30 = arith.addf %28, %29 : vector<16x384xf32>
    %cst_12 = arith.constant 0.000000e+00 : f32
    %31 = vector.broadcast %cst_12 : f32 to vector<8x128xf32>
    %32 = vector.extract_strided_slice %30 {offsets = [0, 0], sizes = [8, 32], strides = [1, 1]} : vector<16x384xf32> to vector<8x32xf32>
    %33 = vector.extract_strided_slice %30 {offsets = [0, 128], sizes = [8, 32], strides = [1, 1]} : vector<16x384xf32> to vector<8x32xf32>
    %34 = vector.extract_strided_slice %30 {offsets = [0, 256], sizes = [8, 32], strides = [1, 1]} : vector<16x384xf32> to vector<8x32xf32>
    %35 = arith.truncf %32 : vector<8x32xf32> to vector<8x32xbf16>
    %36 = arith.truncf %33 : vector<8x32xf32> to vector<8x32xbf16>
    %cst_13 = arith.constant dense<0.000000e+00> : vector<8x8xf32>
    %37 = tpu.matmul %35, %36, %cst_13 {dimension_numbers = #tpu.dot_dimension_numbers<[1], [1], [0], [0], [0, 0, 1, 0], [], []>} : vector<8x32xbf16>, vector<8x32xbf16>, vector<8x8xf32> -> vector<8x8xf32>
    %cst_14 = arith.constant dense<0xFF800000> : vector<8xf32>
    %38 = vector.multi_reduction <maximumf>, %37, %cst_14 [1] : vector<8x8xf32> to vector<8xf32>
    %39 = vector.shape_cast %38 : vector<8xf32> to vector<8x1xf32>
    %40 = vector.broadcast %39 : vector<8x1xf32> to vector<8x8xf32>
    %41 = arith.subf %37, %40 : vector<8x8xf32>
    %42 = math.exp %41 : vector<8x8xf32>
    %cst_15 = arith.constant dense<0.000000e+00> : vector<8xf32>
    %43 = vector.multi_reduction <add>, %42, %cst_15 [1] : vector<8x8xf32> to vector<8xf32>
    %44 = vector.shape_cast %43 : vector<8xf32> to vector<8x1xf32>
    %45 = tpu.reciprocal %44 {approx = true} : vector<8x1xf32> -> vector<8x1xf32>
    %46 = vector.broadcast %45 : vector<8x1xf32> to vector<8x8xf32>
    %47 = arith.mulf %42, %46 : vector<8x8xf32>
    %48 = arith.truncf %47 : vector<8x8xf32> to vector<8x8xbf16>
    %49 = arith.truncf %34 : vector<8x32xf32> to vector<8x32xbf16>
    %cst_16 = arith.constant dense<0.000000e+00> : vector<8x32xf32>
    %50 = tpu.matmul %48, %49, %cst_16 {dimension_numbers = #tpu.dot_dimension_numbers<[1], [0], [0], [1], [0, 0, 1, 1], [], []>} : vector<8x8xbf16>, vector<8x32xbf16>, vector<8x32xf32> -> vector<8x32xf32>
    %51 = vector.extract_strided_slice %20 {offsets = [0, 0], sizes = [32, 128], strides = [1, 1]} : vector<128x128xbf16> to vector<32x128xbf16>
    %52 = arith.truncf %50 : vector<8x32xf32> to vector<8x32xbf16>
    %cst_17 = arith.constant dense<0.000000e+00> : vector<8x128xf32>
    %53 = tpu.matmul %52, %51, %cst_17 {dimension_numbers = #tpu.dot_dimension_numbers<[1], [0], [0], [1], [0, 0, 1, 1], [], []>} : vector<8x32xbf16>, vector<32x128xbf16>, vector<8x128xf32> -> vector<8x128xf32>
    %54 = arith.addf %31, %53 : vector<8x128xf32>
    %55 = vector.extract_strided_slice %30 {offsets = [0, 32], sizes = [8, 32], strides = [1, 1]} : vector<16x384xf32> to vector<8x32xf32>
    %56 = vector.extract_strided_slice %30 {offsets = [0, 160], sizes = [8, 32], strides = [1, 1]} : vector<16x384xf32> to vector<8x32xf32>
    %57 = vector.extract_strided_slice %30 {offsets = [0, 288], sizes = [8, 32], strides = [1, 1]} : vector<16x384xf32> to vector<8x32xf32>
    %58 = arith.truncf %55 : vector<8x32xf32> to vector<8x32xbf16>
    %59 = arith.truncf %56 : vector<8x32xf32> to vector<8x32xbf16>
    %cst_18 = arith.constant dense<0.000000e+00> : vector<8x8xf32>
    %60 = tpu.matmul %58, %59, %cst_18 {dimension_numbers = #tpu.dot_dimension_numbers<[1], [1], [0], [0], [0, 0, 1, 0], [], []>} : vector<8x32xbf16>, vector<8x32xbf16>, vector<8x8xf32> -> vector<8x8xf32>
    %cst_19 = arith.constant dense<0xFF800000> : vector<8xf32>
    %61 = vector.multi_reduction <maximumf>, %60, %cst_19 [1] : vector<8x8xf32> to vector<8xf32>
    %62 = vector.shape_cast %61 : vector<8xf32> to vector<8x1xf32>
    %63 = vector.broadcast %62 : vector<8x1xf32> to vector<8x8xf32>
    %64 = arith.subf %60, %63 : vector<8x8xf32>
    %65 = math.exp %64 : vector<8x8xf32>
    %cst_20 = arith.constant dense<0.000000e+00> : vector<8xf32>
    %66 = vector.multi_reduction <add>, %65, %cst_20 [1] : vector<8x8xf32> to vector<8xf32>
    %67 = vector.shape_cast %66 : vector<8xf32> to vector<8x1xf32>
    %68 = tpu.reciprocal %67 {approx = true} : vector<8x1xf32> -> vector<8x1xf32>
    %69 = vector.broadcast %68 : vector<8x1xf32> to vector<8x8xf32>
    %70 = arith.mulf %65, %69 : vector<8x8xf32>
    %71 = arith.truncf %70 : vector<8x8xf32> to vector<8x8xbf16>
    %72 = arith.truncf %57 : vector<8x32xf32> to vector<8x32xbf16>
    %cst_21 = arith.constant dense<0.000000e+00> : vector<8x32xf32>
    %73 = tpu.matmul %71, %72, %cst_21 {dimension_numbers = #tpu.dot_dimension_numbers<[1], [0], [0], [1], [0, 0, 1, 1], [], []>} : vector<8x8xbf16>, vector<8x32xbf16>, vector<8x32xf32> -> vector<8x32xf32>
    %74 = vector.extract_strided_slice %20 {offsets = [32, 0], sizes = [32, 128], strides = [1, 1]} : vector<128x128xbf16> to vector<32x128xbf16>
    %75 = arith.truncf %73 : vector<8x32xf32> to vector<8x32xbf16>
    %cst_22 = arith.constant dense<0.000000e+00> : vector<8x128xf32>
    %76 = tpu.matmul %75, %74, %cst_22 {dimension_numbers = #tpu.dot_dimension_numbers<[1], [0], [0], [1], [0, 0, 1, 1], [], []>} : vector<8x32xbf16>, vector<32x128xbf16>, vector<8x128xf32> -> vector<8x128xf32>
    %77 = arith.addf %54, %76 : vector<8x128xf32>
    %78 = vector.extract_strided_slice %30 {offsets = [0, 64], sizes = [8, 32], strides = [1, 1]} : vector<16x384xf32> to vector<8x32xf32>
    %79 = vector.extract_strided_slice %30 {offsets = [0, 192], sizes = [8, 32], strides = [1, 1]} : vector<16x384xf32> to vector<8x32xf32>
    %80 = vector.extract_strided_slice %30 {offsets = [0, 320], sizes = [8, 32], strides = [1, 1]} : vector<16x384xf32> to vector<8x32xf32>
    %81 = arith.truncf %78 : vector<8x32xf32> to vector<8x32xbf16>
    %82 = arith.truncf %79 : vector<8x32xf32> to vector<8x32xbf16>
    %cst_23 = arith.constant dense<0.000000e+00> : vector<8x8xf32>
    %83 = tpu.matmul %81, %82, %cst_23 {dimension_numbers = #tpu.dot_dimension_numbers<[1], [1], [0], [0], [0, 0, 1, 0], [], []>} : vector<8x32xbf16>, vector<8x32xbf16>, vector<8x8xf32> -> vector<8x8xf32>
    %cst_24 = arith.constant dense<0xFF800000> : vector<8xf32>
    %84 = vector.multi_reduction <maximumf>, %83, %cst_24 [1] : vector<8x8xf32> to vector<8xf32>
    %85 = vector.shape_cast %84 : vector<8xf32> to vector<8x1xf32>
    %86 = vector.broadcast %85 : vector<8x1xf32> to vector<8x8xf32>
    %87 = arith.subf %83, %86 : vector<8x8xf32>
    %88 = math.exp %87 : vector<8x8xf32>
    %cst_25 = arith.constant dense<0.000000e+00> : vector<8xf32>
    %89 = vector.multi_reduction <add>, %88, %cst_25 [1] : vector<8x8xf32> to vector<8xf32>
    %90 = vector.shape_cast %89 : vector<8xf32> to vector<8x1xf32>
    %91 = tpu.reciprocal %90 {approx = true} : vector<8x1xf32> -> vector<8x1xf32>
    %92 = vector.broadcast %91 : vector<8x1xf32> to vector<8x8xf32>
    %93 = arith.mulf %88, %92 : vector<8x8xf32>
    %94 = arith.truncf %93 : vector<8x8xf32> to vector<8x8xbf16>
    %95 = arith.truncf %80 : vector<8x32xf32> to vector<8x32xbf16>
    %cst_26 = arith.constant dense<0.000000e+00> : vector<8x32xf32>
    %96 = tpu.matmul %94, %95, %cst_26 {dimension_numbers = #tpu.dot_dimension_numbers<[1], [0], [0], [1], [0, 0, 1, 1], [], []>} : vector<8x8xbf16>, vector<8x32xbf16>, vector<8x32xf32> -> vector<8x32xf32>
    %97 = vector.extract_strided_slice %20 {offsets = [64, 0], sizes = [32, 128], strides = [1, 1]} : vector<128x128xbf16> to vector<32x128xbf16>
    %98 = arith.truncf %96 : vector<8x32xf32> to vector<8x32xbf16>
    %cst_27 = arith.constant dense<0.000000e+00> : vector<8x128xf32>
    %99 = tpu.matmul %98, %97, %cst_27 {dimension_numbers = #tpu.dot_dimension_numbers<[1], [0], [0], [1], [0, 0, 1, 1], [], []>} : vector<8x32xbf16>, vector<32x128xbf16>, vector<8x128xf32> -> vector<8x128xf32>
    %100 = arith.addf %77, %99 : vector<8x128xf32>
    %101 = vector.extract_strided_slice %30 {offsets = [0, 96], sizes = [8, 32], strides = [1, 1]} : vector<16x384xf32> to vector<8x32xf32>
    %102 = vector.extract_strided_slice %30 {offsets = [0, 224], sizes = [8, 32], strides = [1, 1]} : vector<16x384xf32> to vector<8x32xf32>
    %103 = vector.extract_strided_slice %30 {offsets = [0, 352], sizes = [8, 32], strides = [1, 1]} : vector<16x384xf32> to vector<8x32xf32>
    %104 = arith.truncf %101 : vector<8x32xf32> to vector<8x32xbf16>
    %105 = arith.truncf %102 : vector<8x32xf32> to vector<8x32xbf16>
    %cst_28 = arith.constant dense<0.000000e+00> : vector<8x8xf32>
    %106 = tpu.matmul %104, %105, %cst_28 {dimension_numbers = #tpu.dot_dimension_numbers<[1], [1], [0], [0], [0, 0, 1, 0], [], []>} : vector<8x32xbf16>, vector<8x32xbf16>, vector<8x8xf32> -> vector<8x8xf32>
    %cst_29 = arith.constant dense<0xFF800000> : vector<8xf32>
    %107 = vector.multi_reduction <maximumf>, %106, %cst_29 [1] : vector<8x8xf32> to vector<8xf32>
    %108 = vector.shape_cast %107 : vector<8xf32> to vector<8x1xf32>
    %109 = vector.broadcast %108 : vector<8x1xf32> to vector<8x8xf32>
    %110 = arith.subf %106, %109 : vector<8x8xf32>
    %111 = math.exp %110 : vector<8x8xf32>
    %cst_30 = arith.constant dense<0.000000e+00> : vector<8xf32>
    %112 = vector.multi_reduction <add>, %111, %cst_30 [1] : vector<8x8xf32> to vector<8xf32>
    %113 = vector.shape_cast %112 : vector<8xf32> to vector<8x1xf32>
    %114 = tpu.reciprocal %113 {approx = true} : vector<8x1xf32> -> vector<8x1xf32>
    %115 = vector.broadcast %114 : vector<8x1xf32> to vector<8x8xf32>
    %116 = arith.mulf %111, %115 : vector<8x8xf32>
    %117 = arith.truncf %116 : vector<8x8xf32> to vector<8x8xbf16>
    %118 = arith.truncf %103 : vector<8x32xf32> to vector<8x32xbf16>
    %cst_31 = arith.constant dense<0.000000e+00> : vector<8x32xf32>
    %119 = tpu.matmul %117, %118, %cst_31 {dimension_numbers = #tpu.dot_dimension_numbers<[1], [0], [0], [1], [0, 0, 1, 1], [], []>} : vector<8x8xbf16>, vector<8x32xbf16>, vector<8x32xf32> -> vector<8x32xf32>
    %120 = vector.extract_strided_slice %20 {offsets = [96, 0], sizes = [32, 128], strides = [1, 1]} : vector<128x128xbf16> to vector<32x128xbf16>
    %121 = arith.truncf %119 : vector<8x32xf32> to vector<8x32xbf16>
    %cst_32 = arith.constant dense<0.000000e+00> : vector<8x128xf32>
    %122 = tpu.matmul %121, %120, %cst_32 {dimension_numbers = #tpu.dot_dimension_numbers<[1], [0], [0], [1], [0, 0, 1, 1], [], []>} : vector<8x32xbf16>, vector<32x128xbf16>, vector<8x128xf32> -> vector<8x128xf32>
    %123 = arith.addf %100, %122 : vector<8x128xf32>
    %cst_33 = arith.constant 0.000000e+00 : f32
    %124 = vector.broadcast %cst_33 : f32 to vector<8x128xf32>
    %125 = vector.extract_strided_slice %30 {offsets = [8, 0], sizes = [8, 32], strides = [1, 1]} : vector<16x384xf32> to vector<8x32xf32>
    %126 = vector.extract_strided_slice %30 {offsets = [8, 128], sizes = [8, 32], strides = [1, 1]} : vector<16x384xf32> to vector<8x32xf32>
    %127 = vector.extract_strided_slice %30 {offsets = [8, 256], sizes = [8, 32], strides = [1, 1]} : vector<16x384xf32> to vector<8x32xf32>
    %128 = arith.truncf %125 : vector<8x32xf32> to vector<8x32xbf16>
    %129 = arith.truncf %126 : vector<8x32xf32> to vector<8x32xbf16>
    %cst_34 = arith.constant dense<0.000000e+00> : vector<8x8xf32>
    %130 = tpu.matmul %128, %129, %cst_34 {dimension_numbers = #tpu.dot_dimension_numbers<[1], [1], [0], [0], [0, 0, 1, 0], [], []>} : vector<8x32xbf16>, vector<8x32xbf16>, vector<8x8xf32> -> vector<8x8xf32>
    %cst_35 = arith.constant dense<0xFF800000> : vector<8xf32>
    %131 = vector.multi_reduction <maximumf>, %130, %cst_35 [1] : vector<8x8xf32> to vector<8xf32>
    %132 = vector.shape_cast %131 : vector<8xf32> to vector<8x1xf32>
    %133 = vector.broadcast %132 : vector<8x1xf32> to vector<8x8xf32>
    %134 = arith.subf %130, %133 : vector<8x8xf32>
    %135 = math.exp %134 : vector<8x8xf32>
    %cst_36 = arith.constant dense<0.000000e+00> : vector<8xf32>
    %136 = vector.multi_reduction <add>, %135, %cst_36 [1] : vector<8x8xf32> to vector<8xf32>
    %137 = vector.shape_cast %136 : vector<8xf32> to vector<8x1xf32>
    %138 = tpu.reciprocal %137 {approx = true} : vector<8x1xf32> -> vector<8x1xf32>
    %139 = vector.broadcast %138 : vector<8x1xf32> to vector<8x8xf32>
    %140 = arith.mulf %135, %139 : vector<8x8xf32>
    %141 = arith.truncf %140 : vector<8x8xf32> to vector<8x8xbf16>
    %142 = arith.truncf %127 : vector<8x32xf32> to vector<8x32xbf16>
    %cst_37 = arith.constant dense<0.000000e+00> : vector<8x32xf32>
    %143 = tpu.matmul %141, %142, %cst_37 {dimension_numbers = #tpu.dot_dimension_numbers<[1], [0], [0], [1], [0, 0, 1, 1], [], []>} : vector<8x8xbf16>, vector<8x32xbf16>, vector<8x32xf32> -> vector<8x32xf32>
    %144 = vector.extract_strided_slice %20 {offsets = [0, 0], sizes = [32, 128], strides = [1, 1]} : vector<128x128xbf16> to vector<32x128xbf16>
    %145 = arith.truncf %143 : vector<8x32xf32> to vector<8x32xbf16>
    %cst_38 = arith.constant dense<0.000000e+00> : vector<8x128xf32>
    %146 = tpu.matmul %145, %144, %cst_38 {dimension_numbers = #tpu.dot_dimension_numbers<[1], [0], [0], [1], [0, 0, 1, 1], [], []>} : vector<8x32xbf16>, vector<32x128xbf16>, vector<8x128xf32> -> vector<8x128xf32>
    %147 = arith.addf %124, %146 : vector<8x128xf32>
    %148 = vector.extract_strided_slice %30 {offsets = [8, 32], sizes = [8, 32], strides = [1, 1]} : vector<16x384xf32> to vector<8x32xf32>
    %149 = vector.extract_strided_slice %30 {offsets = [8, 160], sizes = [8, 32], strides = [1, 1]} : vector<16x384xf32> to vector<8x32xf32>
    %150 = vector.extract_strided_slice %30 {offsets = [8, 288], sizes = [8, 32], strides = [1, 1]} : vector<16x384xf32> to vector<8x32xf32>
    %151 = arith.truncf %148 : vector<8x32xf32> to vector<8x32xbf16>
    %152 = arith.truncf %149 : vector<8x32xf32> to vector<8x32xbf16>
    %cst_39 = arith.constant dense<0.000000e+00> : vector<8x8xf32>
    %153 = tpu.matmul %151, %152, %cst_39 {dimension_numbers = #tpu.dot_dimension_numbers<[1], [1], [0], [0], [0, 0, 1, 0], [], []>} : vector<8x32xbf16>, vector<8x32xbf16>, vector<8x8xf32> -> vector<8x8xf32>
    %cst_40 = arith.constant dense<0xFF800000> : vector<8xf32>
    %154 = vector.multi_reduction <maximumf>, %153, %cst_40 [1] : vector<8x8xf32> to vector<8xf32>
    %155 = vector.shape_cast %154 : vector<8xf32> to vector<8x1xf32>
    %156 = vector.broadcast %155 : vector<8x1xf32> to vector<8x8xf32>
    %157 = arith.subf %153, %156 : vector<8x8xf32>
    %158 = math.exp %157 : vector<8x8xf32>
    %cst_41 = arith.constant dense<0.000000e+00> : vector<8xf32>
    %159 = vector.multi_reduction <add>, %158, %cst_41 [1] : vector<8x8xf32> to vector<8xf32>
    %160 = vector.shape_cast %159 : vector<8xf32> to vector<8x1xf32>
    %161 = tpu.reciprocal %160 {approx = true} : vector<8x1xf32> -> vector<8x1xf32>
    %162 = vector.broadcast %161 : vector<8x1xf32> to vector<8x8xf32>
    %163 = arith.mulf %158, %162 : vector<8x8xf32>
    %164 = arith.truncf %163 : vector<8x8xf32> to vector<8x8xbf16>
    %165 = arith.truncf %150 : vector<8x32xf32> to vector<8x32xbf16>
    %cst_42 = arith.constant dense<0.000000e+00> : vector<8x32xf32>
    %166 = tpu.matmul %164, %165, %cst_42 {dimension_numbers = #tpu.dot_dimension_numbers<[1], [0], [0], [1], [0, 0, 1, 1], [], []>} : vector<8x8xbf16>, vector<8x32xbf16>, vector<8x32xf32> -> vector<8x32xf32>
    %167 = vector.extract_strided_slice %20 {offsets = [32, 0], sizes = [32, 128], strides = [1, 1]} : vector<128x128xbf16> to vector<32x128xbf16>
    %168 = arith.truncf %166 : vector<8x32xf32> to vector<8x32xbf16>
    %cst_43 = arith.constant dense<0.000000e+00> : vector<8x128xf32>
    %169 = tpu.matmul %168, %167, %cst_43 {dimension_numbers = #tpu.dot_dimension_numbers<[1], [0], [0], [1], [0, 0, 1, 1], [], []>} : vector<8x32xbf16>, vector<32x128xbf16>, vector<8x128xf32> -> vector<8x128xf32>
    %170 = arith.addf %147, %169 : vector<8x128xf32>
    %171 = vector.extract_strided_slice %30 {offsets = [8, 64], sizes = [8, 32], strides = [1, 1]} : vector<16x384xf32> to vector<8x32xf32>
    %172 = vector.extract_strided_slice %30 {offsets = [8, 192], sizes = [8, 32], strides = [1, 1]} : vector<16x384xf32> to vector<8x32xf32>
    %173 = vector.extract_strided_slice %30 {offsets = [8, 320], sizes = [8, 32], strides = [1, 1]} : vector<16x384xf32> to vector<8x32xf32>
    %174 = arith.truncf %171 : vector<8x32xf32> to vector<8x32xbf16>
    %175 = arith.truncf %172 : vector<8x32xf32> to vector<8x32xbf16>
    %cst_44 = arith.constant dense<0.000000e+00> : vector<8x8xf32>
    %176 = tpu.matmul %174, %175, %cst_44 {dimension_numbers = #tpu.dot_dimension_numbers<[1], [1], [0], [0], [0, 0, 1, 0], [], []>} : vector<8x32xbf16>, vector<8x32xbf16>, vector<8x8xf32> -> vector<8x8xf32>
    %cst_45 = arith.constant dense<0xFF800000> : vector<8xf32>
    %177 = vector.multi_reduction <maximumf>, %176, %cst_45 [1] : vector<8x8xf32> to vector<8xf32>
    %178 = vector.shape_cast %177 : vector<8xf32> to vector<8x1xf32>
    %179 = vector.broadcast %178 : vector<8x1xf32> to vector<8x8xf32>
    %180 = arith.subf %176, %179 : vector<8x8xf32>
    %181 = math.exp %180 : vector<8x8xf32>
    %cst_46 = arith.constant dense<0.000000e+00> : vector<8xf32>
    %182 = vector.multi_reduction <add>, %181, %cst_46 [1] : vector<8x8xf32> to vector<8xf32>
    %183 = vector.shape_cast %182 : vector<8xf32> to vector<8x1xf32>
    %184 = tpu.reciprocal %183 {approx = true} : vector<8x1xf32> -> vector<8x1xf32>
    %185 = vector.broadcast %184 : vector<8x1xf32> to vector<8x8xf32>
    %186 = arith.mulf %181, %185 : vector<8x8xf32>
    %187 = arith.truncf %186 : vector<8x8xf32> to vector<8x8xbf16>
    %188 = arith.truncf %173 : vector<8x32xf32> to vector<8x32xbf16>
    %cst_47 = arith.constant dense<0.000000e+00> : vector<8x32xf32>
    %189 = tpu.matmul %187, %188, %cst_47 {dimension_numbers = #tpu.dot_dimension_numbers<[1], [0], [0], [1], [0, 0, 1, 1], [], []>} : vector<8x8xbf16>, vector<8x32xbf16>, vector<8x32xf32> -> vector<8x32xf32>
    %190 = vector.extract_strided_slice %20 {offsets = [64, 0], sizes = [32, 128], strides = [1, 1]} : vector<128x128xbf16> to vector<32x128xbf16>
    %191 = arith.truncf %189 : vector<8x32xf32> to vector<8x32xbf16>
    %cst_48 = arith.constant dense<0.000000e+00> : vector<8x128xf32>
    %192 = tpu.matmul %191, %190, %cst_48 {dimension_numbers = #tpu.dot_dimension_numbers<[1], [0], [0], [1], [0, 0, 1, 1], [], []>} : vector<8x32xbf16>, vector<32x128xbf16>, vector<8x128xf32> -> vector<8x128xf32>
    %193 = arith.addf %170, %192 : vector<8x128xf32>
    %194 = vector.extract_strided_slice %30 {offsets = [8, 96], sizes = [8, 32], strides = [1, 1]} : vector<16x384xf32> to vector<8x32xf32>
    %195 = vector.extract_strided_slice %30 {offsets = [8, 224], sizes = [8, 32], strides = [1, 1]} : vector<16x384xf32> to vector<8x32xf32>
    %196 = vector.extract_strided_slice %30 {offsets = [8, 352], sizes = [8, 32], strides = [1, 1]} : vector<16x384xf32> to vector<8x32xf32>
    %197 = arith.truncf %194 : vector<8x32xf32> to vector<8x32xbf16>
    %198 = arith.truncf %195 : vector<8x32xf32> to vector<8x32xbf16>
    %cst_49 = arith.constant dense<0.000000e+00> : vector<8x8xf32>
    %199 = tpu.matmul %197, %198, %cst_49 {dimension_numbers = #tpu.dot_dimension_numbers<[1], [1], [0], [0], [0, 0, 1, 0], [], []>} : vector<8x32xbf16>, vector<8x32xbf16>, vector<8x8xf32> -> vector<8x8xf32>
    %cst_50 = arith.constant dense<0xFF800000> : vector<8xf32>
    %200 = vector.multi_reduction <maximumf>, %199, %cst_50 [1] : vector<8x8xf32> to vector<8xf32>
    %201 = vector.shape_cast %200 : vector<8xf32> to vector<8x1xf32>
    %202 = vector.broadcast %201 : vector<8x1xf32> to vector<8x8xf32>
    %203 = arith.subf %199, %202 : vector<8x8xf32>
    %204 = math.exp %203 : vector<8x8xf32>
    %cst_51 = arith.constant dense<0.000000e+00> : vector<8xf32>
    %205 = vector.multi_reduction <add>, %204, %cst_51 [1] : vector<8x8xf32> to vector<8xf32>
    %206 = vector.shape_cast %205 : vector<8xf32> to vector<8x1xf32>
    %207 = tpu.reciprocal %206 {approx = true} : vector<8x1xf32> -> vector<8x1xf32>
    %208 = vector.broadcast %207 : vector<8x1xf32> to vector<8x8xf32>
    %209 = arith.mulf %204, %208 : vector<8x8xf32>
    %210 = arith.truncf %209 : vector<8x8xf32> to vector<8x8xbf16>
    %211 = arith.truncf %196 : vector<8x32xf32> to vector<8x32xbf16>
    %cst_52 = arith.constant dense<0.000000e+00> : vector<8x32xf32>
    %212 = tpu.matmul %210, %211, %cst_52 {dimension_numbers = #tpu.dot_dimension_numbers<[1], [0], [0], [1], [0, 0, 1, 1], [], []>} : vector<8x8xbf16>, vector<8x32xbf16>, vector<8x32xf32> -> vector<8x32xf32>
    %213 = vector.extract_strided_slice %20 {offsets = [96, 0], sizes = [32, 128], strides = [1, 1]} : vector<128x128xbf16> to vector<32x128xbf16>
    %214 = arith.truncf %212 : vector<8x32xf32> to vector<8x32xbf16>
    %cst_53 = arith.constant dense<0.000000e+00> : vector<8x128xf32>
    %215 = tpu.matmul %214, %213, %cst_53 {dimension_numbers = #tpu.dot_dimension_numbers<[1], [0], [0], [1], [0, 0, 1, 1], [], []>} : vector<8x32xbf16>, vector<32x128xbf16>, vector<8x128xf32> -> vector<8x128xf32>
    %216 = arith.addf %193, %215 : vector<8x128xf32>
    %217 = tpu.concatenate %123, %216 in 0 : vector<8x128xf32>, vector<8x128xf32> -> vector<16x128xf32>
    %218 = arith.addf %3, %217 : vector<16x128xf32>
    %219 = vector.broadcast %8 : vector<1x128xf32> to vector<16x128xf32>
    %220 = arith.addf %218, %219 : vector<16x128xf32>
    %cst_54 = arith.constant dense<0.000000e+00> : vector<16xf32>
    %221 = vector.multi_reduction <add>, %220, %cst_54 [1] : vector<16x128xf32> to vector<16xf32>
    %222 = vector.shape_cast %221 : vector<16xf32> to vector<16x1xf32>
    %cst_55 = arith.constant 1.280000e+02 : f32
    %223 = vector.broadcast %cst_55 : f32 to vector<16x1xf32>
    %224 = arith.divf %222, %223 : vector<16x1xf32>
    %225 = vector.broadcast %224 : vector<16x1xf32> to vector<16x128xf32>
    %226 = arith.subf %220, %225 : vector<16x128xf32>
    %227 = arith.mulf %226, %226 : vector<16x128xf32>
    %cst_56 = arith.constant dense<0.000000e+00> : vector<16xf32>
    %228 = vector.multi_reduction <add>, %227, %cst_56 [1] : vector<16x128xf32> to vector<16xf32>
    %229 = vector.shape_cast %228 : vector<16xf32> to vector<16x1xf32>
    %cst_57 = arith.constant 1.280000e+02 : f32
    %230 = vector.broadcast %cst_57 : f32 to vector<16x1xf32>
    %231 = arith.divf %229, %230 : vector<16x1xf32>
    %232 = vector.broadcast %224 : vector<16x1xf32> to vector<16x128xf32>
    %233 = arith.subf %220, %232 : vector<16x128xf32>
    %cst_58 = arith.constant 9.99999974E-6 : f32
    %234 = vector.broadcast %cst_58 : f32 to vector<16x1xf32>
    %235 = arith.addf %231, %234 : vector<16x1xf32>
    %236 = math.rsqrt %235 : vector<16x1xf32>
    %237 = vector.broadcast %236 : vector<16x1xf32> to vector<16x128xf32>
    %238 = arith.mulf %233, %237 : vector<16x128xf32>
    %239 = vector.broadcast %9 : vector<1x128xf32> to vector<16x128xf32>
    %240 = arith.mulf %238, %239 : vector<16x128xf32>
    %241 = vector.broadcast %10 : vector<1x128xf32> to vector<16x128xf32>
    %242 = arith.addf %240, %241 : vector<16x128xf32>
    %243 = arith.truncf %242 : vector<16x128xf32> to vector<16x128xbf16>
    %cst_59 = arith.constant dense<0.000000e+00> : vector<16x128xf32>
    %244 = tpu.matmul %243, %23, %cst_59 {dimension_numbers = #tpu.dot_dimension_numbers<[1], [0], [0], [1], [0, 0, 1, 1], [], []>} : vector<16x128xbf16>, vector<128x128xbf16>, vector<16x128xf32> -> vector<16x128xf32>
    %245 = vector.broadcast %11 : vector<1x128xf32> to vector<16x128xf32>
    %246 = arith.addf %244, %245 : vector<16x128xf32>
    %cst_60 = arith.constant 0.000000e+00 : f32
    %247 = vector.broadcast %cst_60 : f32 to vector<16x128xf32>
    %248 = arith.maximumf %246, %247 : vector<16x128xf32>
    %249 = arith.truncf %248 : vector<16x128xf32> to vector<16x128xbf16>
    %cst_61 = arith.constant dense<0.000000e+00> : vector<16x128xf32>
    %250 = tpu.matmul %249, %26, %cst_61 {dimension_numbers = #tpu.dot_dimension_numbers<[1], [0], [0], [1], [0, 0, 1, 1], [], []>} : vector<16x128xbf16>, vector<128x128xbf16>, vector<16x128xf32> -> vector<16x128xf32>
    %251 = vector.broadcast %12 : vector<1x128xf32> to vector<16x128xf32>
    %252 = arith.addf %250, %251 : vector<16x128xf32>
    %253 = arith.addf %242, %252 : vector<16x128xf32>
    %cst_62 = arith.constant dense<0.000000e+00> : vector<16xf32>
    %254 = vector.multi_reduction <add>, %253, %cst_62 [1] : vector<16x128xf32> to vector<16xf32>
    %255 = vector.shape_cast %254 : vector<16xf32> to vector<16x1xf32>
    %cst_63 = arith.constant 1.280000e+02 : f32
    %256 = vector.broadcast %cst_63 : f32 to vector<16x1xf32>
    %257 = arith.divf %255, %256 : vector<16x1xf32>
    %258 = vector.broadcast %257 : vector<16x1xf32> to vector<16x128xf32>
    %259 = arith.subf %253, %258 : vector<16x128xf32>
    %260 = arith.mulf %259, %259 : vector<16x128xf32>
    %cst_64 = arith.constant dense<0.000000e+00> : vector<16xf32>
    %261 = vector.multi_reduction <add>, %260, %cst_64 [1] : vector<16x128xf32> to vector<16xf32>
    %262 = vector.shape_cast %261 : vector<16xf32> to vector<16x1xf32>
    %cst_65 = arith.constant 1.280000e+02 : f32
    %263 = vector.broadcast %cst_65 : f32 to vector<16x1xf32>
    %264 = arith.divf %262, %263 : vector<16x1xf32>
    %265 = vector.broadcast %257 : vector<16x1xf32> to vector<16x128xf32>
    %266 = arith.subf %253, %265 : vector<16x128xf32>
    %cst_66 = arith.constant 9.99999974E-6 : f32
    %267 = vector.broadcast %cst_66 : f32 to vector<16x1xf32>
    %268 = arith.addf %264, %267 : vector<16x1xf32>
    %269 = math.rsqrt %268 : vector<16x1xf32>
    %270 = vector.broadcast %269 : vector<16x1xf32> to vector<16x128xf32>
    %271 = arith.mulf %266, %270 : vector<16x128xf32>
    %272 = vector.broadcast %13 : vector<1x128xf32> to vector<16x128xf32>
    %273 = arith.mulf %271, %272 : vector<16x128xf32>
    %274 = vector.broadcast %14 : vector<1x128xf32> to vector<16x128xf32>
    %275 = arith.addf %273, %274 : vector<16x128xf32>
    %c0_67 = arith.constant 0 : index
    %c0_68 = arith.constant 0 : index
    %276 = vector.load %arg14[%c0_67, %c0_68] : memref<16x128xf32, #tpu.memory_space<vmem>>, vector<16x128xf32>
    tpu.vector_store %arg14[%c0_67, %c0_68], %275 {strides = array<i32>} : memref<16x128xf32, #tpu.memory_space<vmem>>, vector<16x128xf32>,
    %c1_i32 = arith.constant 1 : i32
    %277 = arith.cmpi eq, %arg1, %c1_i32 : i32
    %278 = arith.extui %277 : i1 to i32
    %c0_i32_69 = arith.constant 0 : i32
    %279 = arith.cmpi ne, %278, %c0_i32_69 : i32
    scf.if %279 {
      %280 = vector.shape_cast %275 : vector<16x128xf32> to vector<2x8x128xf32>
      %cst_70 = arith.constant dense<0.000000e+00> : vector<2x128xf32>
      %281 = vector.multi_reduction <add>, %280, %cst_70 [1] : vector<2x8x128xf32> to vector<2x128xf32>
      %cst_71 = arith.constant 8.000000e+00 : f32
      %282 = vector.broadcast %cst_71 : f32 to vector<2x128xf32>
      %283 = arith.divf %281, %282 : vector<2x128xf32>
      %c0_72 = arith.constant 0 : index
      %c0_73 = arith.constant 0 : index
      %284 = vector.load %arg6[%c0_72, %c0_73] : memref<128x128xbf16, #tpu.memory_space<vmem>>, vector<128x128xbf16>
      %285 = arith.truncf %283 : vector<2x128xf32> to vector<2x128xbf16>
      %cst_74 = arith.constant dense<0.000000e+00> : vector<2x128xf32>
      %286 = tpu.matmul %285, %284, %cst_74 {dimension_numbers = #tpu.dot_dimension_numbers<[1], [0], [0], [1], [0, 0, 1, 1], [], []>} : vector<2x128xbf16>, vector<128x128xbf16>, vector<2x128xf32> -> vector<2x128xf32>
      %c2 = arith.constant 2 : index
      %c0_75 = arith.constant 0 : index
      %287 = vector.load %arg7[%c2, %c0_75] : memref<8x128xf32, #tpu.memory_space<vmem>>, vector<1x128xf32>
      %288 = vector.broadcast %287 : vector<1x128xf32> to vector<2x128xf32>
      %289 = arith.addf %286, %288 : vector<2x128xf32>
      %c0_76 = arith.constant 0 : index
      %c0_77 = arith.constant 0 : index
      %290 = vector.load %arg13[%c0_76, %c0_77] : memref<2x128xf32, #tpu.memory_space<vmem>>, vector<2x128xf32>
      tpu.vector_store %arg13[%c0_76, %c0_77], %289 {strides = array<i32>} : memref<2x128xf32, #tpu.memory_space<vmem>>, vector<2x128xf32>,
    } else {
    }
    return
  }
  func.func @transform_0(%arg0: i32, %arg1: i32) -> (i32, i32) {
    %c0_i32 = arith.constant 0 : i32
    %c0_i32_0 = arith.constant 0 : i32
    return %arg0, %c0_i32 : i32, i32
  }
  func.func @transform_1(%arg0: i32, %arg1: i32) -> (i32, i32) {
    %c0_i32 = arith.constant 0 : i32
    %c0_i32_0 = arith.constant 0 : i32
    return %arg0, %c0_i32 : i32, i32
  }
  func.func @transform_2(%arg0: i32, %arg1: i32) -> (i32, i32) {
    %c0_i32 = arith.constant 0 : i32
    %c0_i32_0 = arith.constant 0 : i32
    %c0_i32_1 = arith.constant 0 : i32
    return %c0_i32, %c0_i32_0 : i32, i32
  }
  func.func @transform_3(%arg0: i32, %arg1: i32) -> (i32, i32) {
    %c0_i32 = arith.constant 0 : i32
    %c0_i32_0 = arith.constant 0 : i32
    %c0_i32_1 = arith.constant 0 : i32
    return %c0_i32, %c0_i32_0 : i32, i32
  }
  func.func @transform_4(%arg0: i32, %arg1: i32) -> (i32, i32) {
    %c0_i32 = arith.constant 0 : i32
    %c0_i32_0 = arith.constant 0 : i32
    %c0_i32_1 = arith.constant 0 : i32
    return %c0_i32, %c0_i32_0 : i32, i32
  }
  func.func @transform_5(%arg0: i32, %arg1: i32) -> (i32, i32) {
    %c0_i32 = arith.constant 0 : i32
    %c0_i32_0 = arith.constant 0 : i32
    %c0_i32_1 = arith.constant 0 : i32
    return %c0_i32, %c0_i32_0 : i32, i32
  }
  func.func @transform_6(%arg0: i32, %arg1: i32) -> (i32, i32, i32) {
    %c0_i32 = arith.constant 0 : i32
    %c0_i32_0 = arith.constant 0 : i32
    %c0_i32_1 = arith.constant 0 : i32
    %c0_i32_2 = arith.constant 0 : i32
    return %c0_i32, %c0_i32_0, %c0_i32_1 : i32, i32, i32
  }
  func.func @transform_7(%arg0: i32, %arg1: i32) -> (i32, i32, i32) {
    %c0_i32 = arith.constant 0 : i32
    %c0_i32_0 = arith.constant 0 : i32
    %c0_i32_1 = arith.constant 0 : i32
    %c0_i32_2 = arith.constant 0 : i32
    return %c0_i32, %c0_i32_0, %c0_i32_1 : i32, i32, i32
  }
  func.func @transform_8(%arg0: i32, %arg1: i32) -> (i32, i32, i32) {
    %c0_i32 = arith.constant 0 : i32
    %c0_i32_0 = arith.constant 0 : i32
    %c0_i32_1 = arith.constant 0 : i32
    %c0_i32_2 = arith.constant 0 : i32
    return %c0_i32, %c0_i32_0, %c0_i32_1 : i32, i32, i32
  }
  func.func @transform_9(%arg0: i32, %arg1: i32) -> (i32, i32, i32) {
    %c0_i32 = arith.constant 0 : i32
    %c0_i32_0 = arith.constant 0 : i32
    %c0_i32_1 = arith.constant 0 : i32
    %c0_i32_2 = arith.constant 0 : i32
    return %c0_i32, %c0_i32_0, %c0_i32_1 : i32, i32, i32
  }
  func.func @transform_10(%arg0: i32, %arg1: i32) -> (i32, i32, i32) {
    %c0_i32 = arith.constant 0 : i32
    %c0_i32_0 = arith.constant 0 : i32
    %c0_i32_1 = arith.constant 0 : i32
    %c0_i32_2 = arith.constant 0 : i32
    return %c0_i32, %c0_i32_0, %c0_i32_1 : i32, i32, i32
  }
  func.func @transform_11(%arg0: i32, %arg1: i32) -> (i32, i32) {
    %c0_i32 = arith.constant 0 : i32
    %c0_i32_0 = arith.constant 0 : i32
    return %arg0, %c0_i32 : i32, i32
  }
}

</mosaic_0001>

<bundles_post_ra>
// kernel: tpu_custom_call.1
= control target key start
LH: loop header
LB: loop body
LE: loop exit
PB: predicated region body
PF: predicated region fallthrough
CT: control target
= control target key end

     0   :  { %16 = vsyncpa [#allocation4], 0  ;;  %s4478_s0 = inlined_call_operand.vmem [shape: f32[16,16], index: 0, kind: input, shape index: {}]   ;;  %s4479_s1 = inlined_call_operand.vmem [shape: f32[16,2], index: 1, kind: input, shape index: {}]   ;;  %s4480_s2 = inlined_call_operand.hbm [shape: f32[16,128], index: 2, kind: input, shape index: {}]   ;;  %s4481_s3 = inlined_call_operand.hbm [shape: bf16[16,128], index: 3, kind: input, shape index: {}]   ;;  %s4482_s4 = inlined_call_operand.hbm [shape: bf16[128,128], index: 4, kind: input, shape index: {}]   ;;  %s4483_s5 = inlined_call_operand.vmem [shape: f32[8,128], index: 5, kind: input, shape index: {}]   ;;  %s4484_s6 = inlined_call_operand.hbm [shape: bf16[2,128,384], index: 6, kind: input, shape index: {}]   ;;  %s4485_s7 = inlined_call_operand.hbm [shape: bf16[2,128,128], index: 7, kind: input, shape index: {}]   ;;  %s4486_s8 = inlined_call_operand.hbm [shape: bf16[2,128,128], index: 8, kind: input, shape index: {}]   ;;  %s4487_s9 = inlined_call_operand.hbm [shape: bf16[2,128,128], index: 9, kind: input, shape index: {}]   ;;  %s4488_s10 = inlined_call_operand.hbm [shape: f32[2,8,384], index: 10, kind: input, shape index: {}]   ;;  %s4489_s11 = inlined_call_operand.hbm [shape: f32[2,128], index: 11, kind: output, shape index: {}]  }
   0x1   :  { %17 = vsyncpa [#allocation7], 0 }
   0x2   :  { %18 = vsyncpa [#allocation10], 0 }
   0x3   :  { %19 = vsyncpa [#allocation13], 0 }
   0x4   :  { %20 = vsyncpa [#allocation16], 0 }
   0x5   :  { %21 = vsyncpa [#allocation5], 0  ;;  %s3902_s17 = smov 0   ;;  %s3904_s18 = smov 0  }
   0x6   :  { %s3906_s19 = smov 0  }
   0x7 LB: > { %s3813_s20 = smov [#allocation6]   ;;  %s4490_s22 = sadd.s32 4294967295, %s3811_s19   ;;  %s3811_s19 = sphi %s3906_s19, %s27_s19   ;;  %s3807_s18 = sphi %s3904_s18, %s4504_s18   ;;  %s3803_s17 = sphi %s3902_s17, %s4503_s17  }
   0x8   : > { %s354_s21 = sshll.u32 %s3813_s20, 4  ;;  %p2832_p0 = scmp.ge.s32.totalorder %s3811_s19, 1  ;;  %s355_s21 = int_to_ptr.vmem [resolvable:$true] %s354_s21 }
   0x9   : > { %p311_p1 = scmp.lt.s32.totalorder %s3811_s19, 3  ;;  %p3922_p2 = scmp.eq.s32.totalorder %s4490_s22, 0 }
   0xa   : > { %s3814_s25 = smov [#allocation9]   ;;  %s3815_s28 = smov [#allocation12]  }
   0xb   : > { %p3926_p3 = pnand %p2832_p0, %p311_p1  ;;  %s383_s26 = sshll.u32 %s3814_s25, 4  ;;  %s3932_s26 = int_to_ptr.vmem [resolvable:$true] %s383_s26 }
   0xc   : > { %s3940_s29 = sshll.u32 %s3815_s28, 4  ;;  %s3544_s12 = scalar_lea.vmem %s355_s21, 128  ;;  %s410_s29 = int_to_ptr.vmem [resolvable:$true] %s3940_s29 }
   0xd   : > { %p3328_p4 = pneg %p3926_p3  ;;  %p3545_p7 = scmp.ne.s32.totalorder %s355_s21, %s3544_s12 }
   0xe   : > { %p3552_p10 = scmp.lt.s32.totalorder %s355_s21, %s355_s21  ;;  %p3553_p11 = scmp.lt.s32.totalorder %s3544_s12, %s3544_s12 }
   0xf   : > { %p3936_p5 = pnand %p3922_p2, %p3328_p4 }
  0x10   : > { %p3554_p12 = por %p3553_p11, %p3552_p10 }
  0x11   : > { %p3944_p6 = pneg %p3936_p5 }
  0x13   : > { %p3547_p8 = pnand %p3545_p7, %p3944_p6 }
  0x15   : > { %p3548_p9 = pneg %p3547_p8 }
  0x17   : > { %p3555_p13 = pnand %p3554_p12, %p3548_p9 }
  0x19   : > { %3558 = shalt.err (!%p3555_p13)
}
  0x1a   : > { %s4491_s13 = smov 64   ;;  %s4493_s14 = smov 4  }
  0x1b   : > { %3334 = dma.hbm_to_vmem [thread:$0]  (!%p3936_p5), %s4481_s3, 128, %s355_s21, [#allocation7], %s4491_s13, %s4491_s13, %s4493_s14  }
  0x1c   : > { %s3570_s20 = scalar_lea.vmem %s3932_s26, 6144  ;;  %p3578_p7 = scmp.lt.s32.totalorder %s3932_s26, %s3932_s26 }
  0x1d   : > { %p3571_p0 = scmp.ne.s32.totalorder %s3932_s26, %s3570_s20  ;;  %p3579_p8 = scmp.lt.s32.totalorder %s3570_s20, %s3570_s20 }
  0x1f   : > { %p3573_p1 = pnand %p3571_p0, %p3944_p6  ;;  %p3580_p9 = por %p3579_p8, %p3578_p7 }
  0x21   : > { %p3574_p4 = pneg %p3573_p1 }
  0x23   : > { %p3581_p10 = pnand %p3580_p9, %p3574_p4 }
  0x25   : > { %3584 = shalt.err (!%p3581_p10)
}
  0x26   : > { %s3818_s25 = smov 192   ;;  %s3819_s28 = smov 12  }
  0x27   : > { %3340 = dma.hbm_to_vmem [thread:$0]  (!%p3936_p5), %s4484_s6, 6144, %s3932_s26, [#allocation10], %s3818_s25, %s3818_s25, %s3819_s28  }
  0x28   : > { %s3596_s15 = scalar_lea.vmem %s410_s29, 2048  ;;  %p3604_p0 = scmp.lt.s32.totalorder %s410_s29, %s410_s29 }
  0x29   : > { %p3597_p11 = scmp.ne.s32.totalorder %s410_s29, %s3596_s15  ;;  %p3605_p1 = scmp.lt.s32.totalorder %s3596_s15, %s3596_s15 }
  0x2b   : > { %p3599_p12 = pnand %p3597_p11, %p3944_p6  ;;  %p3606_p4 = por %p3605_p1, %p3604_p0 }
  0x2d   : > { %p3600_p13 = pneg %p3599_p12 }
  0x2f   : > { %p3607_p7 = pnand %p3606_p4, %p3600_p13 }
  0x31   : > { %3610 = shalt.err (!%p3607_p7)
}
  0x32   : > { %3346 = dma.hbm_to_vmem [thread:$0]  (!%p3936_p5), %s4486_s8, 2048, %s410_s29, [#allocation13], %s4491_s13, %s4491_s13, %s4493_s14  }
  0x33   : > { %s36_s26 = sadd.s32 1, %s3807_s18  ;;  %s3820_s25 = smov [#allocation3]  }
  0x34   : > { %p37_p8 = scmp.ge.s32.totalorder %s36_s26, 2  ;;  %s341_s28 = sshll.u32 %s3820_s25, 4  ;;  %s342_s28 = int_to_ptr.vmem [resolvable:$true] %s341_s28 }
  0x35   : > { %s3622_s12 = scalar_lea.vmem %s342_s28, 256  ;;  %p3630_p12 = scmp.lt.s32.totalorder %s342_s28, %s342_s28 }
  0x36   : > { %s4506_s26 = smov (%p37_p8, %s36_s26), 0  ;;  %p3623_p9 = scmp.ne.s32.totalorder %s342_s28, %s3622_s12 }
  0x37   : > { %p3631_p13 = scmp.lt.s32.totalorder %s3622_s12, %s3622_s12 }
  0x38   : > { %p3625_p10 = pnand %p3623_p9, %p3944_p6 }
  0x39   : > { %p3632_p0 = por %p3631_p13, %p3630_p12 }
  0x3a   : > { %p3626_p11 = pneg %p3625_p10 }
  0x3c   : > { %p3633_p1 = pnand %p3632_p0, %p3626_p11 }
  0x3e   : > { %3636 = shalt.err (!%p3633_p1)
}
  0x3f   : > { %s3821_s21 = smov 128   ;;  %s3822_s29 = smov 8  }
  0x40   : > { %3331 = dma.hbm_to_vmem [thread:$0]  (!%p3936_p5), %s4480_s2, 256, %s342_s28, [#allocation4], %s3821_s21, %s3821_s21, %s3822_s29  }
  0x41   : > { %s3823_s20 = smov [#allocation8]   ;;  %s3824_s22 = smov [#allocation11]  }
  0x42   : > { %s367_s25 = sshll.u32 %s3823_s20, 4  ;;  %s396_s13 = sshll.u32 %s3824_s22, 4  ;;  %s368_s25 = int_to_ptr.vmem [resolvable:$true] %s367_s25  ;;  %s397_s13 = int_to_ptr.vmem [resolvable:$true] %s396_s13 }
  0x43   : > { %s3648_s14 = scalar_lea.vmem %s368_s25, 1024  ;;  %p3656_p9 = scmp.lt.s32.totalorder %s368_s25, %s368_s25 }
  0x44   : > { %p3649_p4 = scmp.ne.s32.totalorder %s368_s25, %s3648_s14  ;;  %p3657_p10 = scmp.lt.s32.totalorder %s3648_s14, %s3648_s14 }
  0x46   : > { %p3651_p7 = pnand %p3649_p4, %p3944_p6  ;;  %p3658_p11 = por %p3657_p10, %p3656_p9 }
  0x48   : > { %p3652_p8 = pneg %p3651_p7 }
  0x4a   : > { %p3659_p12 = pnand %p3658_p11, %p3652_p8 }
  0x4c   : > { %3662 = shalt.err (!%p3659_p12)
}
  0x4d   : > { %s4499_s12 = smov 4   ;;  %s4500_s15 = smov 64  }
  0x4e   : > { %3337 = dma.hbm_to_vmem [thread:$0]  (!%p3936_p5), %s4482_s4, 1024, %s368_s25, [#allocation7], %s4500_s15, %s4500_s15, %s4499_s12  }
  0x4f   : > { %s3674_s22 = scalar_lea.vmem %s397_s13, 2048  ;;  %p3682_p4 = scmp.lt.s32.totalorder %s397_s13, %s397_s13 }
  0x50   : > { %p3675_p13 = scmp.ne.s32.totalorder %s397_s13, %s3674_s22  ;;  %p3683_p7 = scmp.lt.s32.totalorder %s3674_s22, %s3674_s22 }
  0x52   : > { %p3677_p0 = pnand %p3675_p13, %p3944_p6  ;;  %p3684_p8 = por %p3683_p7, %p3682_p4 }
  0x54   : > { %p3678_p1 = pneg %p3677_p0 }
  0x56   : > { %p3685_p9 = pnand %p3684_p8, %p3678_p1 }
  0x58   : > { %3688 = shalt.err (!%p3685_p9)
}
  0x59   : > { %3343 = dma.hbm_to_vmem [thread:$0]  (!%p3936_p5), %s4485_s7, 2048, %s397_s13, [#allocation10], %s4500_s15, %s4500_s15, %s4499_s12  }
  0x5a   : > { %s3825_s16 = smov [#allocation14]   ;;  %s3826_s25 = smov [#allocation15]  }
  0x5b   : > { %s422_s20 = sshll.u32 %s3825_s16, 4  ;;  %s435_s28 = sshll.u32 %s3826_s25, 4  ;;  %s423_s20 = int_to_ptr.vmem [resolvable:$true] %s422_s20  ;;  %s436_s28 = int_to_ptr.vmem [resolvable:$true] %s435_s28 }
  0x5c   : > { %s3700_s21 = scalar_lea.vmem %s423_s20, 2048  ;;  %p3708_p13 = scmp.lt.s32.totalorder %s423_s20, %s423_s20 }
  0x5d   : > { %p3701_p10 = scmp.ne.s32.totalorder %s423_s20, %s3700_s21  ;;  %p3709_p0 = scmp.lt.s32.totalorder %s3700_s21, %s3700_s21 }
  0x5f   : > { %p3703_p11 = pnand %p3701_p10, %p3944_p6  ;;  %p3710_p1 = por %p3709_p0, %p3708_p13 }
  0x61   : > { %p3704_p12 = pneg %p3703_p11 }
  0x63   : > { %p3711_p4 = pnand %p3710_p1, %p3704_p12 }
  0x65   : > { %3714 = shalt.err (!%p3711_p4)
}
  0x66   : > { %3349 = dma.hbm_to_vmem [thread:$0]  (!%p3936_p5), %s4487_s9, 2048, %s423_s20, [#allocation13], %s4500_s15, %s4500_s15, %s4499_s12  }
  0x67   : > { %s3726_s14 = scalar_lea.vmem %s436_s28, 768  ;;  %p3734_p10 = scmp.lt.s32.totalorder %s436_s28, %s436_s28 }
  0x68   : > { %p3727_p7 = scmp.ne.s32.totalorder %s436_s28, %s3726_s14  ;;  %p3735_p11 = scmp.lt.s32.totalorder %s3726_s14, %s3726_s14 }
  0x6a   : > { %p3729_p8 = pnand %p3727_p7, %p3944_p6  ;;  %p3736_p12 = por %p3735_p11, %p3734_p10 }
  0x6c   : > { %p3730_p9 = pneg %p3729_p8 }
  0x6e   : > { %p3737_p13 = pnand %p3736_p12, %p3730_p9 }
  0x70   : > { %3740 = shalt.err (!%p3737_p13)
}
  0x71   : > { %s3827_s29 = smov 384   ;;  %s3828_s16 = smov 24  }
  0x72   : > { %3352 = dma.hbm_to_vmem [thread:$0]  (!%p3936_p5), %s4488_s10, 768, %s436_s28, [#allocation16], %s3827_s29, %s3827_s29, %s3828_s16  }
  0x73   : > { %451 = sbr.rel (%p3926_p3) target bundleno = 5847 (0x16d7), region = 64 }
  0x78   : > { %3778 = dma.done.wait (%p3922_p2), [#allocation4], 256  }
  0x79   : > { %3780 = vsyncadd (%p3922_p2), [#allocation4], 4294967040 }
  0x7a   : > { %3782 = dma.done.wait (%p3922_p2), [#allocation7], 1152  }
  0x7b   : > { %3784 = vsyncadd (%p3922_p2), [#allocation7], 4294966144 }
  0x7c   : > { %3786 = dma.done.wait (%p3922_p2), [#allocation10], 8192  }
  0x7d   : > { %3788 = vsyncadd (%p3922_p2), [#allocation10], 4294959104 }
  0x7e   : > { %3790 = dma.done.wait (%p3922_p2), [#allocation13], 4096  }
  0x7f   : > { %3792 = vsyncadd (%p3922_p2), [#allocation13], 4294963200 }
  0x80   : > { %3794 = dma.done.wait (%p3922_p2), [#allocation16], 768  }
  0x81   : > { %3796 = vsyncadd (%p3922_p2), [#allocation16], 4294966528  ;;  %p2852_p3 = scmp.ne.s32.totalorder %s3803_s17, 0 }
  0x83   : > { %535 = sbr.rel (%p2852_p3) target bundleno = 349 (0x15d), region = 100 }
  0x88   : > { %v3427_v0 = vld [vmem:[#allocation6] sm:$0xff]   ;;  %v3829_v1 = vmov 0.0   ;;  %v537_v3 = vld [vmem:[%s4478_s0 + $0x8] sm:$0xff]  ;;  %vm3830_vm0 = vmmov 0   ;;  %vm554_vm1 = vcmask 130048   ;;  %v3831_v6 = vmov 0  }
  0x89   : > { %3046 = vmatprep.subr.bf16.mxu0 %v3829_v1  ;;  %v536_v2 = vld [vmem:[%s4478_s0] sm:$0xff]  ;;  %3048 = vmatprep.mubr.msk.bf16.mxu0 %vm3830_vm0, %v3829_v1  ;;  %v3832_v7 = vmov 1   ;;  %v539_v8 = vld [vmem:[%s4479_s1 + $0x8] sm:$0xff]  ;;  %v544_v9 = vlaneseq  ;;  %v639_v34 = vld [vmem:[#allocation3] sm:$0xff] }
  0x8a   : > { %v538_v4 = vld [vmem:[%s4479_s1] sm:$0xff]  ;;  %3047 = vmatpush3.bf16.msra.mxu0 %v3427_v0  ;;  %v543_v5 = vpack.c.bf16 %v537_v3, %v536_v2  ;;  %3424 = vset.pattern.permute.xlu0 %v3831_v6  ;;  %v640_v41 = vld [vmem:[#allocation3 + $0x8] sm:$0xff] }
  0x8b   : > { %3425 = vset.pattern.permute.xlu1 %v3832_v7  ;;  %601 = vperm.xlu0 %3424, %v538_v4   ;;  %v545_v10 = vshrl.u32 %v544_v9, 7  ;;  %v540_v12 = vld [vmem:[%s4483_s5] sm:$0xff] }
  0x8c   : > { %618 = vperm.xlu1 %3425, %v538_v4  }
  0x8d   : > { %3049 = vmatmul.mubr.msk.bf16.vlgmr.msra.gmra.mxu0 %vm554_vm1, %v543_v5  ;;  %v611_v11 = vsub.s32 3, %v545_v10  ;;  %v627_v13 = vsub.s32 4, %v545_v10  ;;  %v546_v14 = vsub.s32 0, %v545_v10  ;;  %v635_v21 = vsub.s32 1, %v545_v10 }
  0x8f   : > { %606 = vperm.xlu0 %3424, %v539_v8   ;;  %v612_v15 = vrot.slane %v540_v12, %v611_v11  ;;  %v628_v17 = vrot.slane %v540_v12, %v627_v13  ;;  %v547_v18 = vrot.slane %v540_v12, %v546_v14  ;;  %v636_v28 = vrot.slane %v540_v12, %v635_v21 }
  0x90   : > { %622 = vperm.xlu1 %3425, %v539_v8  }
  0x93   : > { %3426 = vset.pattern.permute.xlu0 %v3832_v7 }
 0x106   : > { %v602_v16 = vpop.permute.xlu0 %601 }
 0x107   : > { %v619_v19 = vpop.permute.xlu1 %618  ;;  %v613_v20 = vmul.f32 %v612_v15, %v602_v16 }
 0x108   : > { %v629_v23 = vmul.f32 %v628_v17, %v619_v19 }
 0x10a   : > { %v607_v25 = vpop.permute.xlu0 %606 }
 0x10b   : > { %v623_v29 = vpop.permute.xlu1 %622  ;;  %v614_v31 = vmul.f32 %v612_v15, %v607_v25 }
 0x10c   : > { %v630_v37 = vmul.f32 %v628_v17, %v623_v29 }
 0x14d   : > { %v592_v22 = vpop.f32.mrf.mxu0 }
 0x14e   : > { %v593_v24 = vadd.f32 %v592_v22, %v547_v18 }
 0x14f   : > { %v3050_v26 = vpop.f32.mrf.mxu0 }
 0x150   : > { %v615_v27 = vadd.f32 %v613_v20, %v593_v24 }
 0x151   : > { %v595_v30 = vpop.f32.mrf.mxu0 }
 0x152   : > { %v631_v32 = vadd.f32 %v629_v23, %v615_v27  ;;  %v596_v33 = vadd.f32 %v595_v30, %v547_v18 }
 0x153   : > { %v3051_v35 = vpop.f32.mrf.mxu0 }
 0x154   : > { %v637_v36 = vadd.f32 %v636_v28, %v631_v32  ;;  %v616_v38 = vadd.f32 %v614_v31, %v596_v33 }
 0x156   : > { %v641_v39 = vadd.f32 %v639_v34, %v637_v36  ;;  %v632_v40 = vadd.f32 %v630_v37, %v616_v38 }
 0x158   : > { %643 = vst [vmem:[#allocation2] sm:$0xff] %v641_v39  ;;  %v638_v42 = vadd.f32 %v636_v28, %v632_v40 }
 0x15a   : > { %v642_v43 = vadd.f32 %v640_v41, %v638_v42 }
 0x15c   : > { %644 = vst [vmem:[#allocation2 + $0x8] sm:$0xff] %v642_v43 }
 0x15d PF: > { %s2948_s14 = smul.u32 192, %s3803_s17  ;;  %v3833_v44 = vmov 0   ;;  %v3834_v0 = vmov 0.0   ;;  %vm3835_vm2 = vmmov 0   ;;  %v744_v1 = vlaneseq  ;;  %s3836_s21 = smov 96  }
 0x15e   : > { %916 = vmatprep.mubr.bf16.mxu0 %v3833_v44  ;;  %3052 = vmatprep.subr.bf16.mxu1 %v3834_v0  ;;  %s2947_s16 = smul.u32 24, %s3803_s17  ;;  %vm970_vm3 = vcmask 261120   ;;  %vm1017_vm4 = vcmask 64512   ;;  %vm1034_vm5 = vcmask 1043456   ;;  %s3837_s24 = smov 64  }
 0x15f   : > { %s4067_s29 = scalar_lea.vmem [#allocation9], %s2948_s14  ;;  %v4085_v61 = vld [vmem:[#allocation2] sm:$0xff]  ;;  %3068 = vmatprep.mubr.msk.bf16.mxu1 %vm3835_vm2, %v3834_v0  ;;  %v4098_v2 = vshrl.u32 %v744_v1, 7  ;;  %s4179_s27 = sshll.u32 %s3803_s17, 6 }
 0x160   : > { %v3428_v45 = vld [vmem:[%s4067_s29 + $0xac] ss:$12 sps:$4 sm:$0xff]   ;;  %v3430_v46 = vld [vmem:[%s4067_s29 + $0xa8] ss:$12 sps:$4 sm:$0xff]   ;;  %v3433_v48 = vld [vmem:[%s4067_s29 + $0x90] ss:$12 sps:$4 sm:$0xff]  }
 0x161   : > { %884 = vmatprep.subr.bf16.mxu0 %v3428_v45  ;;  %v3431_v47 = vld [vmem:[%s4067_s29 + $0x94] ss:$12 sps:$4 sm:$0xff]   ;;  %v3434_v49 = vld [vmem:[%s4067_s29 + $0x7c] ss:$12 sps:$4 sm:$0xff]   ;;  %v3436_v50 = vld [vmem:[%s4067_s29 + $0x78] ss:$12 sps:$4 sm:$0xff]  }
 0x162   : > { %885 = vmatpush1.bf16.msra.mxu0 %v3430_v46  ;;  %v3437_v51 = vld [vmem:[%s4067_s29 + $0x64] ss:$12 sps:$4 sm:$0xff]   ;;  %v3439_v52 = vld [vmem:[%s4067_s29 + $0x60] ss:$12 sps:$4 sm:$0xff]   ;;  %v3442_v54 = vld [vmem:[%s4067_s29 + $0x48] ss:$12 sps:$4 sm:$0xff]  }
 0x163   : > { %886 = vmatprep.subr.bf16.mxu0 %v3431_v47  ;;  %v3440_v53 = vld [vmem:[%s4067_s29 + $0x4c] ss:$12 sps:$4 sm:$0xff]   ;;  %v3443_v55 = vld [vmem:[%s4067_s29 + $0x34] ss:$12 sps:$4 sm:$0xff]   ;;  %v3445_v56 = vld [vmem:[%s4067_s29 + $0x30] ss:$12 sps:$4 sm:$0xff]  }
 0x164   : > { %v3446_v57 = vld [vmem:[%s4067_s29 + $0x1c] ss:$12 sps:$4 sm:$0xff]   ;;  %v3448_v58 = vld [vmem:[%s4067_s29 + $0x18] ss:$12 sps:$4 sm:$0xff]   ;;  %v3451_v60 = vld [vmem:[%s4067_s29] ss:$12 sps:$4 sm:$0xff]  }
 0x165   : > { %v3449_v59 = vld [vmem:[%s4067_s29 + $0x4] ss:$12 sps:$4 sm:$0xff]   ;;  %v4087_v62 = vld [vmem:[#allocation2 + $0x8] sm:$0xff]  ;;  %s4100_s25 = scalar_lea.vmem [#allocation15], %s2947_s16  ;;  %v4104_v4 = vsub.s32 0, %v4098_v2  ;;  %s4182_s30 = scalar_lea.vmem [#allocation11], %s4179_s27 }
 0x166   : > { %887 = vmatpush1.bf16.msra.mxu0 %v3433_v48  ;;  %v743_v63 = vpack.c.bf16 %v4087_v62, %v4085_v61  ;;  %v651_v3 = vld [vmem:[%s4100_s25 + $0x8] sm:$0xff]  ;;  %v4107_v5 = vld [vmem:[%s4100_s25] sm:$0xff]  ;;  %v3452_v17 = vld [vmem:[%s4067_s29 + $0xb0] ss:$12 sps:$4 sm:$0xff]   ;;  %s3838_s12 = smov 32   ;;  %s708_s15 = scalar_lea.vmem [#allocation12], %s4179_s27 }
 0x167   : > { %888 = vmatprep.subr.bf16.mxu0 %v3434_v49  ;;  %v4110_v6 = vrot.slane %v651_v3, %v4104_v4  ;;  %v747_v8 = vrot.slane %v4107_v5, %v4104_v4  ;;  %3053 = vmatpush3.bf16.msra.mxu1 %v3452_v17  ;;  %v3453_v18 = vld [vmem:[%s4067_s29 + $0x98] ss:$12 sps:$4 sm:$0xff]   ;;  %v3454_v19 = vld [vmem:[%s4067_s29 + $0x80] ss:$12 sps:$4 sm:$0xff]   ;;  %v3455_v20 = vld [vmem:[%s4067_s29 + $0x68] ss:$12 sps:$4 sm:$0xff]  }
 0x168   : > { %3054 = vmatprep.subr.bf16.mxu1 %v3834_v0  ;;  %v3456_v21 = vld [vmem:[%s4067_s29 + $0x50] ss:$12 sps:$4 sm:$0xff]   ;;  %v3457_v22 = vld [vmem:[%s4067_s29 + $0x38] ss:$12 sps:$4 sm:$0xff]   ;;  %v3458_v23 = vld [vmem:[%s4067_s29 + $0x20] ss:$12 sps:$4 sm:$0xff]  }
 0x169   : > { %v3459_v24 = vld [vmem:[%s4067_s29 + $0x8] ss:$12 sps:$4 sm:$0xff]   ;;  %v4188_v3 = vld [vmem:[%s4182_s30 + $0x18] sm:$0xff]   ;;  %v4205_v17 = vld [vmem:[%s4182_s30] sm:$0xff]   ;;  %s4415_s20 = scalar_lea.vmem [#allocation14], %s4179_s27  ;;  %p2933_p2 = scmp.ne.s32.totalorder %s3803_s17, 1 }
 0x16a   : > { %889 = vmatpush1.bf16.msra.mxu0 %v3436_v50  ;;  %v652_v46 = vld [vmem:[%s4100_s25 + $0x10] sm:$0xff] }
 0x16b   : > { %890 = vmatprep.subr.bf16.mxu0 %v3437_v51  ;;  %3055 = vmatpush3.bf16.msra.mxu1 %v3453_v18  ;;  %v755_v47 = vrot.slane %v652_v46, %v4104_v4  ;;  %v4192_v4 = vld [vmem:[%s4182_s30 + $0x10] sm:$0xff]  }
 0x16c   : > { %3056 = vmatprep.subr.bf16.mxu1 %v3834_v0 }
 0x16e   : > { %891 = vmatpush1.bf16.msra.mxu0 %v3439_v52 }
 0x16f   : > { %892 = vmatprep.subr.bf16.mxu0 %v3440_v53  ;;  %3057 = vmatpush3.bf16.msra.mxu1 %v3454_v19 }
 0x170   : > { %3058 = vmatprep.subr.bf16.mxu1 %v3834_v0 }
 0x172   : > { %893 = vmatpush1.bf16.msra.mxu0 %v3442_v54 }
 0x173   : > { %894 = vmatprep.subr.bf16.mxu0 %v3443_v55  ;;  %3059 = vmatpush3.bf16.msra.mxu1 %v3455_v20 }
 0x174   : > { %3060 = vmatprep.subr.bf16.mxu1 %v3834_v0 }
 0x176   : > { %895 = vmatpush1.bf16.msra.mxu0 %v3445_v56 }
 0x177   : > { %896 = vmatprep.subr.bf16.mxu0 %v3446_v57  ;;  %3061 = vmatpush3.bf16.msra.mxu1 %v3456_v21 }
 0x178   : > { %3062 = vmatprep.subr.bf16.mxu1 %v3834_v0 }
 0x17a   : > { %897 = vmatpush1.bf16.msra.mxu0 %v3448_v58 }
 0x17b   : > { %898 = vmatprep.subr.bf16.mxu0 %v3449_v59  ;;  %3063 = vmatpush3.bf16.msra.mxu1 %v3457_v22 }
 0x17c   : > { %3064 = vmatprep.subr.bf16.mxu1 %v3834_v0 }
 0x17e   : > { %899 = vmatpush1.bf16.msra.mxu0 %v3451_v60 }
 0x17f   : > { %3072 = vmatprep.subr.bf16.mxu0 %v3834_v0  ;;  %3065 = vmatpush3.bf16.msra.mxu1 %v3458_v23 }
 0x180   : > { %3066 = vmatprep.subr.bf16.mxu1 %v3834_v0 }
 0x181   : > { %917 = vmatmul.mubr.bf16.vlgmr.msra.gmra.mxu0 %v743_v63 }
 0x182   : > { %3074 = vmatprep.mubr.msk.bf16.mxu0 %vm3835_vm2, %v3834_v0 }
 0x183   : > { %3067 = vmatpush3.bf16.msra.mxu1 %v3459_v24 }
 0x184   : > { %3078 = vmatprep.subr.bf16.mxu1 %v3834_v0 }
 0x186   : > { %3069 = vmatmul.mubr.bf16.vlgmr.msra.gmra.mxu1 %v743_v63 }
 0x187   : > { %3080 = vmatprep.mubr.msk.bf16.mxu1 %vm3835_vm2, %v3834_v0 }
 0x241   : > { %v918_v7 = vpop.f32.mrf.mxu0 }
 0x242   : > { %v919_v12 = vadd.f32 %v918_v7, %v747_v8 }
 0x243   : > { %v920_v9 = vpop.f32.mrf.mxu0 }
 0x244   : > { %v921_v10 = vadd.f32 %v920_v9, %v4110_v6  ;;  %v4123_v16 = vpack.c.bf16 %v919_v12, %v919_v12  ;;  %v4200_v12 = vld [vmem:[%s4182_s30 + $0x8] sm:$0xff]  }
 0x245   : > { %v922_v11 = vpop.f32.mrf.mxu0 }
 0x246   : > { %v4115_v13 = vpack.c.bf16 %v921_v10, %v921_v10  ;;  %v4117_v14 = vadd.f32 %v922_v11, %v747_v8  ;;  %v961_v42 = vpop.f32.mrf.mxu1 }
 0x247   : > { %v4155_v28 = vpop.f32.mrf.mxu0  ;;  %v962_v48 = vadd.f32 %v961_v42, %v755_v47 }
 0x248   : > { %1083 = vrot.lane.b32.xlu0 %v4115_v13, %s3836_s21  ;;  %v975_v15 = vsel %vm970_vm3, %v4115_v13, 0  ;;  %v3070_v43 = vpop.f32.mrf.mxu1 }
 0x249   : > { %3073 = vmatpush3.bf16.xpose.msra.mxu0 %v975_v15  ;;  %v4162_v49 = vpack.c.bf16 %v962_v48, %v962_v48 }
 0x24a   : > { %3084 = vmatprep.subr.bf16.mxu0 %v3834_v0  ;;  %v964_v50 = vpop.f32.mrf.mxu1 }
 0x24b   : > { %v4164_v51 = vadd.f32 %v964_v50, %v755_v47  ;;  %v1036_v52 = vsel %vm1034_vm5, %v4162_v49, 0 }
 0x24c   : > { %1080 = vrot.lane.b32.xlu0 %v4123_v16, %s3836_s21  ;;  %v3071_v53 = vpop.f32.mrf.mxu1  ;;  %3079 = vmatpush3.bf16.msra.mxu1 %v1036_v52 }
 0x24d   : > { %3090 = vmatprep.subr.bf16.mxu1 %v3834_v0 }
 0x250   : > { %3075 = vmatmul.mubr.msk.bf16.vlgmr.msra.gmra.mxu0 %vm970_vm3, %v4123_v16 }
 0x251   : > { %3086 = vmatprep.mubr.msk.bf16.mxu0 %vm3835_vm2, %v3834_v0 }
 0x2ba   : > { %v1084_v25 = vpop.permute.xlu0 %1083 }
 0x2bb   : > { %v1089_v26 = vsel %vm970_vm3, %v1084_v25, 0 }
 0x2bc   : > { %3085 = vmatpush3.bf16.xpose.msra.mxu0 %v1089_v26 }
 0x2bd   : > { %3096 = vmatprep.subr.bf16.mxu0 %v3834_v0 }
 0x2be   : > { %v1081_v27 = vpop.permute.xlu0 %1080 }
 0x2c3   : > { %3087 = vmatmul.mubr.msk.bf16.vlgmr.msra.gmra.mxu0 %vm970_vm3, %v1081_v27 }
 0x2c4   : > { %3100 = vmatprep.mubr.msk.bf16.mxu0 %vm3835_vm2, %v3834_v0  ;;  %3097 = vmatpush3.bf16.msra.mxu0 %v4188_v3 }
 0x2c5   : > { %3098 = vmatprep.subr.bf16.mxu0 %v3834_v0 }
 0x2c8   : > { %3099 = vmatpush3.bf16.msra.mxu0 %v4192_v4 }
 0x2c9   : > { %3112 = vmatprep.subr.bf16.mxu0 %v3834_v0 }
 0x310   : > { %v1011_v29 = vpop.f32.mrf.mxu0 }
 0x311   : > { %v1018_v30 = vsel %vm1017_vm4, %v1011_v29, -inf }
 0x312   : > { %1019 = vmax.xlane.f32.xlu1 %v1018_v30  ;;  %v3076_v31 = vpop.f32.mrf.mxu0 }
 0x314   : > { %v1014_v32 = vpop.f32.mrf.mxu0 }
 0x316   : > { %v3077_v33 = vpop.f32.mrf.mxu0 }
 0x383   : > { %v1125_v34 = vpop.f32.mrf.mxu0 }
 0x384   : > { %v1131_v35 = vsel %vm1017_vm4, %v1125_v34, -inf }
 0x385   : > { %1132 = vmax.xlane.f32.xlu1 %v1131_v35  ;;  %v3088_v36 = vpop.f32.mrf.mxu0 }
 0x387   : > { %v1128_v37 = vpop.f32.mrf.mxu0 }
 0x389   : > { %v3089_v38 = vpop.f32.mrf.mxu0 }
 0x39b   : > { %v1020_v39 = vpop.xlane.xlu1 %1019 }
 0x39c   : > { %v1021_v40 = vsub.f32 %v1011_v29, %v1020_v39 }
 0x39e   : > { %v1022_v41 = vmul.f32 1.442695, %v1021_v40 }
 0x3a0   : > { %3484 = vpow2.f32 %v1022_v41 }
 0x3ad   : > { %v3485_v44 = vpop.eup %3484 }
 0x3ae   : > { %v1024_v45 = vsel %vm1017_vm4, %v3485_v44, 0.0 }
 0x3af   : > { %1025 = vadd.xlane.f32.xlu0 %v1024_v45 }
 0x3c5   : > { %1365 = vrot.lane.b32.xlu0 %v4162_v49, %s3837_s24 }
 0x40e   : > { %v1133_v54 = vpop.xlane.xlu1 %1132 }
 0x40f   : > { %v1134_v55 = vsub.f32 %v1125_v34, %v1133_v54  ;;  %v4236_v54 = vld [vmem:[%s4182_s30 + $0x28] sm:$0xff]  }
 0x411   : > { %v1135_v56 = vmul.f32 1.442695, %v1134_v55 }
 0x413   : > { %3486 = vpow2.f32 %v1135_v56 }
 0x420   : > { %v3487_v57 = vpop.eup %3486 }
 0x421   : > { %v1137_v58 = vsel %vm1017_vm4, %v3487_v57, 0.0 }
 0x422   : > { %1138 = vadd.xlane.f32.xlu1 %v1137_v58 }
 0x433   : > { %1144 = vrot.lane.b32.xlu1 %v4162_v49, %s3836_s21 }
 0x437   : > { %1305 = vrot.lane.b32.xlu1 %v4115_v13, %s3837_s24 }
 0x438   : > { %v1026_v59 = vpop.xlane.xlu0 %1025 }
 0x439   : > { %3488 = vrcp.f32 %v1026_v59 }
 0x43b   : > { %1303 = vrot.lane.b32.xlu1 %v4123_v16, %s3837_s24 }
 0x43c   : > { %v1366_v18 = vpop.permute.xlu0 %1365 }
 0x43d   : > { %v1371_v22 = vsel %vm1034_vm5, %v1366_v18, 0 }
 0x446   : > { %v3489_v60 = vpop.eup %3488 }
 0x447   : > { %v1028_v63 = vmul.f32 %v3489_v60, %v3485_v44 }
 0x449   : > { %v1029_v1 = vpack.c.bf16 %v1028_v63, %v1028_v63 }
 0x44b   : > { %3081 = vmatmul.mubr.msk.bf16.vlgmr.msra.gmra.mxu1 %vm1017_vm4, %v1029_v1 }
 0x44c   : > { %3092 = vmatprep.mubr.msk.bf16.mxu1 %vm3835_vm2, %v3834_v0 }
 0x4ab   : > { %v1139_v7 = vpop.xlane.xlu1 %1138 }
 0x4ac   : > { %3490 = vrcp.f32 %v1139_v7 }
 0x4af   : > { %v1145_v8 = vpop.permute.xlu1 %1144 }
 0x4b0   : > { %v1150_v9 = vsel %vm1034_vm5, %v1145_v8, 0 }
 0x4b1   : > { %3091 = vmatpush3.bf16.msra.mxu1 %v1150_v9 }
 0x4b2   : > { %3104 = vmatprep.subr.bf16.mxu1 %v3834_v0 }
 0x4b3   : > { %v1306_v25 = vpop.permute.xlu1 %1305 }
 0x4b4   : > { %v1311_v30 = vsel %vm970_vm3, %v1306_v25, 0  ;;  %v925_v25 = vadd.f32 %v4155_v28, %v4110_v6 }
 0x4b7   : > { %v1304_v33 = vpop.permute.xlu1 %1303 }
 0x4b9   : > { %v3491_v10 = vpop.eup %3490 }
 0x4ba   : > { %v1141_v11 = vmul.f32 %v3491_v10, %v3487_v57 }
 0x4bc   : > { %v1142_v15 = vpack.c.bf16 %v1141_v11, %v1141_v11 }
 0x4be   : > { %3093 = vmatmul.mubr.msk.bf16.vlgmr.msra.gmra.mxu1 %vm1017_vm4, %v1142_v15 }
 0x4bf   : > { %3105 = vmatpush3.bf16.msra.mxu1 %v4200_v12  ;;  %3108 = vmatprep.mubr.msk.bf16.mxu1 %vm3835_vm2, %v3834_v0 }
 0x4c0   : > { %3106 = vmatprep.subr.bf16.mxu1 %v3834_v0 }
 0x4c3   : > { %3107 = vmatpush3.bf16.msra.mxu1 %v4205_v17 }
 0x4c4   : > { %3118 = vmatprep.subr.bf16.mxu1 %v3834_v0 }
 0x50b   : > { %v1072_v19 = vpop.f32.mrf.mxu1 }
 0x50c   : > { %v1078_v20 = vpack.c.bf16 %v1072_v19, %v1072_v19 }
 0x50d   : > { %v3082_v21 = vpop.f32.mrf.mxu1 }
 0x50e   : > { %3109 = vmatmul.mubr.msk.bf16.vlgmr.msra.gmra.mxu1 %vm970_vm3, %v1078_v20 }
 0x50f   : > { %3119 = vmatpush3.bf16.msra.mxu1 %v1371_v22  ;;  %v1075_v23 = vpop.f32.mrf.mxu1  ;;  %3120 = vmatprep.mubr.msk.bf16.mxu1 %vm3835_vm2, %v3834_v0 }
 0x510   : > { %3132 = vmatprep.subr.bf16.mxu1 %v3834_v0 }
 0x511   : > { %v3083_v24 = vpop.f32.mrf.mxu1 }
 0x57e   : > { %v1186_v26 = vpop.f32.mrf.mxu1 }
 0x57f   : > { %v1192_v27 = vpack.c.bf16 %v1186_v26, %v1186_v26  ;;  %v4262_v26 = vpack.c.bf16 %v925_v25, %v925_v25 }
 0x580   : > { %v3094_v29 = vpop.f32.mrf.mxu1 }
 0x581   : > { %3101 = vmatmul.mubr.msk.bf16.vlgmr.msra.gmra.mxu0 %vm970_vm3, %v1192_v27  ;;  %v4268_v27 = vpack.c.bf16 %v4117_v14, %v4117_v14 }
 0x582   : > { %3113 = vmatpush3.bf16.xpose.msra.mxu0 %v1311_v30  ;;  %v1189_v31 = vpop.f32.mrf.mxu1  ;;  %3114 = vmatprep.mubr.msk.bf16.mxu0 %vm3835_vm2, %v3834_v0 }
 0x583   : > { %3124 = vmatprep.subr.bf16.mxu0 %v3834_v0 }
 0x584   : > { %v3095_v32 = vpop.f32.mrf.mxu1 }
 0x585   : > { %v4277_v32 = vld [vmem:[%s4182_s30 + $0x38] sm:$0xff]  }
 0x589   : > { %3115 = vmatmul.mubr.msk.bf16.vlgmr.msra.gmra.mxu0 %vm970_vm3, %v1304_v33  ;;  %v4281_v33 = vld [vmem:[%s4182_s30 + $0x30] sm:$0xff]  }
 0x58a   : > { %3128 = vmatprep.mubr.msk.bf16.mxu0 %vm3835_vm2, %v3834_v0  ;;  %3125 = vmatpush3.bf16.msra.mxu0 %v4236_v54 }
 0x58b   : > { %3126 = vmatprep.subr.bf16.mxu0 %v3834_v0 }
 0x5ce   : > { %v4225_v34 = vpop.f32.mrf.mxu1 }
 0x5d0   : > { %v3110_v35 = vpop.f32.mrf.mxu1 }
 0x5d2   : > { %v1300_v36 = vpop.f32.mrf.mxu1 }
 0x5d4   : > { %v3111_v37 = vpop.f32.mrf.mxu1 }
 0x641   : > { %v4227_v38 = vpop.f32.mrf.mxu0 }
 0x642   : > { %v1298_v29 = vadd.f32 %v4225_v34, %v4227_v38 }
 0x643   : > { %v3102_v39 = vpop.f32.mrf.mxu0 }
 0x644   : > { %v1643_v39 = vsel %vm970_vm3, %v4262_v26, 0 }
 0x645   : > { %v1245_v40 = vpop.f32.mrf.mxu0 }
 0x647   : > { %v3103_v41 = vpop.f32.mrf.mxu0 }
 0x649   : > { %v1347_v42 = vpop.f32.mrf.mxu0 }
 0x64a   : > { %v1353_v43 = vsel %vm1017_vm4, %v1347_v42, -inf }
 0x64b   : > { %1354 = vmax.xlane.f32.xlu1 %v1353_v43  ;;  %v3116_v44 = vpop.f32.mrf.mxu0  ;;  %v4309_v43 = vpack.c.bf16 %v4164_v51, %v4164_v51 }
 0x64d   : > { %v1350_v45 = vpop.f32.mrf.mxu0 }
 0x64f   : > { %v3117_v46 = vpop.f32.mrf.mxu0 }
 0x6d4   : > { %v1355_v47 = vpop.xlane.xlu1 %1354 }
 0x6d5   : > { %v1356_v48 = vsub.f32 %v1347_v42, %v1355_v47 }
 0x6d7   : > { %v1357_v50 = vmul.f32 1.442695, %v1356_v48 }
 0x6d9   : > { %3492 = vpow2.f32 %v1357_v50 }
 0x6e6   : > { %v3493_v52 = vpop.eup %3492 }
 0x6e7   : > { %v1359_v53 = vsel %vm1017_vm4, %v3493_v52, 0.0 }
 0x6e8   : > { %1360 = vadd.xlane.f32.xlu0 %v1359_v53 }
 0x6fe   : > { %1472 = vrot.lane.b32.xlu0 %v4115_v13, %s3838_s12 }
 0x702   : > { %1470 = vrot.lane.b32.xlu0 %v4123_v16, %s3838_s12  ;;  %v4249_v16 = vld [vmem:[%s4182_s30 + $0x20] sm:$0xff]  }
 0x703   : > { %3127 = vmatpush3.bf16.msra.mxu0 %v4249_v16 }
 0x704   : > { %3138 = vmatprep.subr.bf16.mxu0 %v3834_v0 }
 0x771   : > { %v1361_v55 = vpop.xlane.xlu0 %1360 }
 0x772   : > { %3494 = vrcp.f32 %v1361_v55 }
 0x775   : > { %v1473_v58 = vpop.permute.xlu0 %1472 }
 0x776   : > { %v1478_v60 = vsel %vm970_vm3, %v1473_v58, 0 }
 0x779   : > { %v1471_v13 = vpop.permute.xlu0 %1470 }
 0x77f   : > { %v3495_v56 = vpop.eup %3494 }
 0x780   : > { %v1363_v57 = vmul.f32 %v3495_v56, %v3493_v52 }
 0x782   : > { %v1364_v59 = vpack.c.bf16 %v1363_v57, %v1363_v57 }
 0x784   : > { %3121 = vmatmul.mubr.msk.bf16.vlgmr.msra.gmra.mxu1 %vm1017_vm4, %v1364_v59 }
 0x785   : > { %3133 = vmatpush3.bf16.xpose.msra.mxu1 %v1478_v60  ;;  %3134 = vmatprep.mubr.msk.bf16.mxu1 %vm3835_vm2, %v3834_v0 }
 0x786   : > { %3144 = vmatprep.subr.bf16.mxu1 %v3834_v0 }
 0x78c   : > { %3135 = vmatmul.mubr.msk.bf16.vlgmr.msra.gmra.mxu1 %vm970_vm3, %v1471_v13 }
 0x78d   : > { %3148 = vmatprep.mubr.msk.bf16.mxu1 %vm3835_vm2, %v3834_v0  ;;  %3145 = vmatpush3.bf16.msra.mxu1 %v4277_v32 }
 0x78e   : > { %3146 = vmatprep.subr.bf16.mxu1 %v3834_v0 }
 0x791   : > { %3147 = vmatpush3.bf16.msra.mxu1 %v4281_v33 }
 0x792   : > { %3158 = vmatprep.subr.bf16.mxu1 %v3834_v0 }
 0x844   : > { %v1407_v63 = vpop.f32.mrf.mxu1 }
 0x845   : > { %v1413_v1 = vpack.c.bf16 %v1407_v63, %v1407_v63 }
 0x846   : > { %v3122_v7 = vpop.f32.mrf.mxu1 }
 0x847   : > { %3129 = vmatmul.mubr.msk.bf16.vlgmr.msra.gmra.mxu0 %vm970_vm3, %v1413_v1 }
 0x848   : > { %v1410_v8 = vpop.f32.mrf.mxu1  ;;  %3140 = vmatprep.mubr.msk.bf16.mxu0 %vm3835_vm2, %v3834_v0 }
 0x84a   : > { %v3123_v9 = vpop.f32.mrf.mxu1 }
 0x84c   : > { %v1514_v10 = vpop.f32.mrf.mxu1 }
 0x84d   : > { %v1520_v11 = vsel %vm1017_vm4, %v1514_v10, -inf }
 0x84e   : > { %1521 = vmax.xlane.f32.xlu0 %v1520_v11  ;;  %v3136_v15 = vpop.f32.mrf.mxu1 }
 0x850   : > { %v1517_v18 = vpop.f32.mrf.mxu1 }
 0x852   : > { %v3137_v19 = vpop.f32.mrf.mxu1 }
 0x8d7   : > { %v1522_v20 = vpop.xlane.xlu0 %1521 }
 0x8d8   : > { %v1523_v21 = vsub.f32 %v1514_v10, %v1522_v20 }
 0x8da   : > { %v1524_v22 = vmul.f32 1.442695, %v1523_v21 }
 0x8dc   : > { %3496 = vpow2.f32 %v1524_v22 }
 0x8e9   : > { %v3497_v23 = vpop.eup %3496 }
 0x8ea   : > { %v1526_v24 = vsel %vm1017_vm4, %v3497_v23, 0.0 }
 0x8eb   : > { %1527 = vadd.xlane.f32.xlu1 %v1526_v24 }
 0x8fc   : > { %1532 = vrot.lane.b32.xlu1 %v4162_v49, %s3838_s12 }
 0x900   : > { %1749 = vrot.lane.b32.xlu1 %v4262_v26, %s3836_s21 }
 0x904   : > { %1746 = vrot.lane.b32.xlu1 %v4268_v27, %s3836_s21 }
 0x907   : > { %v1463_v30 = vpop.f32.mrf.mxu0 }
 0x908   : > { %v4274_v6 = vadd.f32 %v1463_v30, %v1298_v29 }
 0x909   : > { %v3130_v28 = vpop.f32.mrf.mxu0 }
 0x90b   : > { %v1466_v49 = vpop.f32.mrf.mxu0 }
 0x90d   : > { %v3131_v31 = vpop.f32.mrf.mxu0 }
 0x974   : > { %v1528_v14 = vpop.xlane.xlu1 %1527 }
 0x975   : > { %3498 = vrcp.f32 %v1528_v14 }
 0x978   : > { %v1533_v34 = vpop.permute.xlu1 %1532 }
 0x979   : > { %v1538_v35 = vsel %vm1034_vm5, %v1533_v34, 0 }
 0x97a   : > { %3139 = vmatpush3.bf16.msra.mxu0 %v1538_v35 }
 0x97b   : > { %3152 = vmatprep.subr.bf16.mxu0 %v3834_v0 }
 0x97c   : > { %v1750_v40 = vpop.permute.xlu1 %1749 }
 0x97d   : > { %v1755_v41 = vsel %vm970_vm3, %v1750_v40, 0 }
 0x980   : > { %v1747_v42 = vpop.permute.xlu1 %1746 }
 0x982   : > { %v3499_v36 = vpop.eup %3498 }
 0x983   : > { %v1530_v37 = vmul.f32 %v3499_v36, %v3497_v23 }
 0x985   : > { %v1531_v38 = vpack.c.bf16 %v1530_v37, %v1530_v37 }
 0x987   : > { %3141 = vmatmul.mubr.msk.bf16.vlgmr.msra.gmra.mxu0 %vm1017_vm4, %v1531_v38 }
 0x988   : > { %3153 = vmatpush3.bf16.xpose.msra.mxu0 %v1643_v39  ;;  %3154 = vmatprep.mubr.msk.bf16.mxu0 %vm3835_vm2, %v3834_v0 }
 0x989   : > { %3164 = vmatprep.subr.bf16.mxu0 %v3834_v0 }
 0x98f   : > { %3155 = vmatmul.mubr.msk.bf16.vlgmr.msra.gmra.mxu0 %vm970_vm3, %v4268_v27 }
 0x990   : > { %3165 = vmatpush3.bf16.xpose.msra.mxu0 %v1755_v41  ;;  %3166 = vmatprep.mubr.msk.bf16.mxu0 %vm3835_vm2, %v3834_v0 }
 0x991   : > { %3176 = vmatprep.subr.bf16.mxu0 %v3834_v0 }
 0x997   : > { %3167 = vmatmul.mubr.msk.bf16.vlgmr.msra.gmra.mxu0 %vm970_vm3, %v1747_v42 }
 0x998   : > { %3177 = vmatpush3.bf16.msra.mxu0 %v4188_v3  ;;  %3180 = vmatprep.mubr.msk.bf16.mxu0 %vm3835_vm2, %v3834_v0  ;;  %v1702_v3 = vsel %vm1034_vm5, %v4309_v43, 0 }
 0x999   : > { %3178 = vmatprep.subr.bf16.mxu0 %v3834_v0 }
 0x99c   : > { %3179 = vmatpush3.bf16.msra.mxu0 %v4192_v4 }
 0x99d   : > { %3192 = vmatprep.subr.bf16.mxu0 %v3834_v0 }
 0xa47   : > { %v1574_v44 = vpop.f32.mrf.mxu0 }
 0xa48   : > { %v1580_v45 = vpack.c.bf16 %v1574_v44, %v1574_v44 }
 0xa49   : > { %v3142_v46 = vpop.f32.mrf.mxu0 }
 0xa4a   : > { %3149 = vmatmul.mubr.msk.bf16.vlgmr.msra.gmra.mxu1 %vm970_vm3, %v1580_v45 }
 0xa4b   : > { %3159 = vmatpush3.bf16.msra.mxu1 %v1702_v3  ;;  %v1577_v47 = vpop.f32.mrf.mxu0  ;;  %3160 = vmatprep.mubr.msk.bf16.mxu1 %vm3835_vm2, %v3834_v0 }
 0xa4c   : > { %3170 = vmatprep.subr.bf16.mxu1 %v3834_v0 }
 0xa4d   : > { %v3143_v4 = vpop.f32.mrf.mxu0 }
 0xa4f   : > { %v1679_v48 = vpop.f32.mrf.mxu0 }
 0xa50   : > { %v1685_v51 = vsel %vm1017_vm4, %v1679_v48, -inf }
 0xa51   : > { %1686 = vmax.xlane.f32.xlu1 %v1685_v51  ;;  %v3156_v50 = vpop.f32.mrf.mxu0 }
 0xa53   : > { %v1682_v52 = vpop.f32.mrf.mxu0 }
 0xa55   : > { %v3157_v53 = vpop.f32.mrf.mxu0 }
 0xa57   : > { %v1791_v55 = vpop.f32.mrf.mxu0 }
 0xa58   : > { %v1797_v56 = vsel %vm1017_vm4, %v1791_v55, -inf }
 0xa59   : > { %1798 = vmax.xlane.f32.xlu0 %v1797_v56  ;;  %v3168_v57 = vpop.f32.mrf.mxu0 }
 0xa5b   : > { %v1794_v58 = vpop.f32.mrf.mxu0 }
 0xa5d   : > { %v3169_v59 = vpop.f32.mrf.mxu0 }
 0xa62   : > { %1945 = vrot.lane.b32.xlu1 %v4268_v27, %s3837_s24 }
 0xada   : > { %v1687_v60 = vpop.xlane.xlu1 %1686 }
 0xadb   : > { %v1688_v13 = vsub.f32 %v1679_v48, %v1687_v60 }
 0xadd   : > { %v1689_v63 = vmul.f32 1.442695, %v1688_v13 }
 0xade   : > { %v1946_v45 = vpop.permute.xlu1 %1945 }
 0xadf   : > { %3500 = vpow2.f32 %v1689_v63 }
 0xae2   : > { %v1799_v1 = vpop.xlane.xlu0 %1798 }
 0xae3   : > { %v1800_v7 = vsub.f32 %v1791_v55, %v1799_v1 }
 0xae5   : > { %v1801_v8 = vmul.f32 1.442695, %v1800_v7 }
 0xae7   : > { %3502 = vpow2.f32 %v1801_v8 }
 0xaec   : > { %v3501_v9 = vpop.eup %3500 }
 0xaed   : > { %v1691_v10 = vsel %vm1017_vm4, %v3501_v9, 0.0 }
 0xaee   : > { %1692 = vadd.xlane.f32.xlu0 %v1691_v10 }
 0xaf4   : > { %v3503_v11 = vpop.eup %3502 }
 0xaf5   : > { %v1803_v15 = vsel %vm1017_vm4, %v3503_v11, 0.0 }
 0xaf6   : > { %1804 = vadd.xlane.f32.xlu0 %v1803_v15 }
 0xb0a   : > { %v1630_v18 = vpop.f32.mrf.mxu1 }
 0xb0b   : > { %v4324_v19 = vadd.f32 %v1630_v18, %v4274_v6 }
 0xb0c   : > { %v3150_v20 = vpop.f32.mrf.mxu1  ;;  %1810 = vrot.lane.b32.xlu0 %v4309_v43, %s3836_s21 }
 0xb0e   : > { %v1633_v21 = vpop.f32.mrf.mxu1 }
 0xb10   : > { %v3151_v22 = vpop.f32.mrf.mxu1  ;;  %1947 = vrot.lane.b32.xlu0 %v4262_v26, %s3837_s24 }
 0xb77   : > { %v1693_v23 = vpop.xlane.xlu0 %1692 }
 0xb78   : > { %3504 = vrcp.f32 %v1693_v23 }
 0xb7f   : > { %v1805_v24 = vpop.xlane.xlu0 %1804 }
 0xb80   : > { %3506 = vrcp.f32 %v1805_v24 }
 0xb83   : > { %v1811_v30 = vpop.permute.xlu0 %1810 }
 0xb84   : > { %v1816_v6 = vsel %vm1034_vm5, %v1811_v30, 0 }
 0xb85   : > { %v3505_v25 = vpop.eup %3504 }
 0xb86   : > { %v1695_v29 = vmul.f32 %v3505_v25, %v3501_v9 }
 0xb88   : > { %v1696_v28 = vpack.c.bf16 %v1695_v29, %v1695_v29 }
 0xb8a   : > { %3161 = vmatmul.mubr.msk.bf16.vlgmr.msra.gmra.mxu1 %vm1017_vm4, %v1696_v28 }
 0xb8b   : > { %3171 = vmatpush3.bf16.msra.mxu1 %v1816_v6  ;;  %3172 = vmatprep.mubr.msk.bf16.mxu1 %vm3835_vm2, %v3834_v0 }
 0xb8c   : > { %3184 = vmatprep.subr.bf16.mxu1 %v3834_v0 }
 0xb8d   : > { %v3507_v49 = vpop.eup %3506 }
 0xb8e   : > { %v1807_v31 = vmul.f32 %v3507_v49, %v3503_v11 }
 0xb90   : > { %v1808_v14 = vpack.c.bf16 %v1807_v31, %v1807_v31 }
 0xb92   : > { %3173 = vmatmul.mubr.msk.bf16.vlgmr.msra.gmra.mxu1 %vm1017_vm4, %v1808_v14  ;;  %v2259_v14 = vsub.s32 1, %v4098_v2 }
 0xb93   : > { %3185 = vmatpush3.bf16.msra.mxu1 %v4200_v12  ;;  %3188 = vmatprep.mubr.msk.bf16.mxu1 %vm3835_vm2, %v3834_v0  ;;  %v1948_v12 = vpop.permute.xlu0 %1947 }
 0xb94   : > { %3186 = vmatprep.subr.bf16.mxu1 %v3834_v0  ;;  %v1953_v42 = vsel %vm970_vm3, %v1948_v12, 0 }
 0xb97   : > { %3187 = vmatpush3.bf16.msra.mxu1 %v4205_v17 }
 0xb98   : > { %3198 = vmatprep.subr.bf16.mxu1 %v3834_v0 }
 0xc4a   : > { %v1738_v34 = vpop.f32.mrf.mxu1 }
 0xc4b   : > { %v1744_v35 = vpack.c.bf16 %v1738_v34, %v1738_v34 }
 0xc4c   : > { %v3162_v36 = vpop.f32.mrf.mxu1 }
 0xc4d   : > { %3189 = vmatmul.mubr.msk.bf16.vlgmr.msra.gmra.mxu1 %vm970_vm3, %v1744_v35  ;;  %v2255_v35 = vadd.f32 %v4324_v19, %v4085_v61  ;;  %v2260_v36 = vrot.slane %v4107_v5, %v2259_v14 }
 0xc4e   : > { %v1741_v37 = vpop.f32.mrf.mxu1  ;;  %3200 = vmatprep.mubr.msk.bf16.mxu1 %vm3835_vm2, %v3834_v0 }
 0xc4f   : > { %v2261_v37 = vadd.f32 %v2260_v36, %v2255_v35 }
 0xc50   : > { %v3163_v38 = vpop.f32.mrf.mxu1 }
 0xc52   : > { %v1852_v39 = vpop.f32.mrf.mxu1 }
 0xc53   : > { %v1858_v40 = vpack.c.bf16 %v1852_v39, %v1852_v39 }
 0xc54   : > { %v3174_v41 = vpop.f32.mrf.mxu1 }
 0xc55   : > { %3181 = vmatmul.mubr.msk.bf16.vlgmr.msra.gmra.mxu0 %vm970_vm3, %v1858_v40 }
 0xc56   : > { %3193 = vmatpush3.bf16.xpose.msra.mxu0 %v1953_v42  ;;  %v1855_v17 = vpop.f32.mrf.mxu1  ;;  %3194 = vmatprep.mubr.msk.bf16.mxu0 %vm3835_vm2, %v3834_v0 }
 0xc57   : > { %3204 = vmatprep.subr.bf16.mxu0 %v3834_v0 }
 0xc58   : > { %v3175_v44 = vpop.f32.mrf.mxu1 }
 0xc5d   : > { %3195 = vmatmul.mubr.msk.bf16.vlgmr.msra.gmra.mxu0 %vm970_vm3, %v1946_v45 }
 0xc5e   : > { %3205 = vmatpush3.bf16.msra.mxu0 %v4236_v54  ;;  %3208 = vmatprep.mubr.msk.bf16.mxu0 %vm3835_vm2, %v3834_v0 }
 0xc5f   : > { %3206 = vmatprep.subr.bf16.mxu0 %v3834_v0 }
 0xc62   : > { %3207 = vmatpush3.bf16.msra.mxu0 %v4249_v16 }
 0xc63   : > { %3218 = vmatprep.subr.bf16.mxu0 %v3834_v0 }
 0xd0d   : > { %v1939_v46 = vpop.f32.mrf.mxu1 }
 0xd0f   : > { %v3190_v3 = vpop.f32.mrf.mxu1 }
 0xd11   : > { %v1942_v47 = vpop.f32.mrf.mxu1 }
 0xd13   : > { %v3191_v4 = vpop.f32.mrf.mxu1 }
 0xd15   : > { %v1896_v48 = vpop.f32.mrf.mxu0 }
 0xd16   : > { %v4357_v51 = vadd.f32 %v1939_v46, %v1896_v48 }
 0xd17   : > { %v3182_v50 = vpop.f32.mrf.mxu0 }
 0xd19   : > { %v1899_v52 = vpop.f32.mrf.mxu0 }
 0xd1b   : > { %v3183_v53 = vpop.f32.mrf.mxu0 }
 0xd1d   : > { %v1989_v54 = vpop.f32.mrf.mxu0 }
 0xd1e   : > { %v1995_v55 = vsel %vm1017_vm4, %v1989_v54, -inf }
 0xd1f   : > { %1996 = vmax.xlane.f32.xlu0 %v1995_v55  ;;  %v3196_v56 = vpop.f32.mrf.mxu0 }
 0xd21   : > { %v1992_v57 = vpop.f32.mrf.mxu0 }
 0xd23   : > { %v3197_v58 = vpop.f32.mrf.mxu0 }
 0xd24   : > { %v3468_v58 = vld [vmem:[%s708_s15 + $0x38] sm:$0xff]  }
 0xd35   : > { %2007 = vrot.lane.b32.xlu0 %v4309_v43, %s3837_s24 }
 0xd39   : > { %2100 = vrot.lane.b32.xlu0 %v4268_v27, %s3838_s12 }
 0xda8   : > { %v1997_v16 = vpop.xlane.xlu0 %1996 }
 0xda9   : > { %v1998_v59 = vsub.f32 %v1989_v54, %v1997_v16  ;;  %v3469_v16 = vld [vmem:[%s708_s15 + $0x30] sm:$0xff]  }
 0xdab   : > { %v1999_v60 = vmul.f32 1.442695, %v1998_v59 }
 0xdac   : > { %v2008_v13 = vpop.permute.xlu0 %2007 }
 0xdad   : > { %3508 = vpow2.f32 %v1999_v60  ;;  %v2013_v63 = vsel %vm1034_vm5, %v2008_v13, 0 }
 0xdae   : > { %3199 = vmatpush3.bf16.msra.mxu1 %v2013_v63 }
 0xdaf   : > { %3212 = vmatprep.subr.bf16.mxu1 %v3834_v0 }
 0xdb0   : > { %v2101_v18 = vpop.permute.xlu0 %2100 }
 0xdba   : > { %v3509_v1 = vpop.eup %3508 }
 0xdbb   : > { %v2001_v7 = vsel %vm1017_vm4, %v3509_v1, 0.0 }
 0xdbc   : > { %2002 = vadd.xlane.f32.xlu1 %v2001_v7  ;;  %v3472_v7 = vld [vmem:[%s708_s15 + $0x18] sm:$0xff]  }
 0xdcd   : > { %2102 = vrot.lane.b32.xlu1 %v4262_v26, %s3838_s12 }
 0xe45   : > { %v2003_v8 = vpop.xlane.xlu1 %2002 }
 0xe46   : > { %3510 = vrcp.f32 %v2003_v8  ;;  %v3473_v8 = vld [vmem:[%s708_s15 + $0x10] sm:$0xff]  }
 0xe49   : > { %v2103_v10 = vpop.permute.xlu1 %2102 }
 0xe4a   : > { %v2108_v15 = vsel %vm970_vm3, %v2103_v10, 0  ;;  %v3476_v10 = vld [vmem:[%s4415_s20 + $0x38] sm:$0xff]  }
 0xe53   : > { %v3511_v27 = vpop.eup %3510 }
 0xe54   : > { %v2005_v9 = vmul.f32 %v3511_v27, %v3509_v1  ;;  %v3470_v1 = vld [vmem:[%s708_s15 + $0x28] sm:$0xff]  }
 0xe55   : > { %v3474_v27 = vld [vmem:[%s708_s15 + $0x8] sm:$0xff]  }
 0xe56   : > { %v2006_v11 = vpack.c.bf16 %v2005_v9, %v2005_v9  ;;  %v3475_v9 = vld [vmem:[%s708_s15] sm:$0xff]  }
 0xe58   : > { %3201 = vmatmul.mubr.msk.bf16.vlgmr.msra.gmra.mxu1 %vm1017_vm4, %v2006_v11  ;;  %v3477_v11 = vld [vmem:[%s4415_s20 + $0x30] sm:$0xff]  }
 0xe59   : > { %3213 = vmatpush3.bf16.xpose.msra.mxu1 %v2108_v15  ;;  %3214 = vmatprep.mubr.msk.bf16.mxu1 %vm3835_vm2, %v3834_v0  ;;  %v3478_v15 = vld [vmem:[%s4415_s20 + $0x28] sm:$0xff]  }
 0xe5a   : > { %3224 = vmatprep.subr.bf16.mxu1 %v3834_v0 }
 0xe60   : > { %3215 = vmatmul.mubr.msk.bf16.vlgmr.msra.gmra.mxu1 %vm970_vm3, %v2101_v18  ;;  %v3479_v18 = vld [vmem:[%s4415_s20 + $0x20] sm:$0xff]  }
 0xe61   : > { %3225 = vmatpush3.bf16.msra.mxu1 %v4277_v32  ;;  %3228 = vmatprep.mubr.msk.bf16.mxu1 %vm3835_vm2, %v3834_v0 }
 0xe62   : > { %3226 = vmatprep.subr.bf16.mxu1 %v3834_v0 }
 0xe65   : > { %3227 = vmatpush3.bf16.msra.mxu1 %v4281_v33 }
 0xe66   : > { %3252 = vmatprep.subr.bf16.mxu1 %v3834_v0 }
 0xf18   : > { %v2049_v26 = vpop.f32.mrf.mxu1 }
 0xf19   : > { %v2055_v20 = vpack.c.bf16 %v2049_v26, %v2049_v26  ;;  %v3480_v26 = vld [vmem:[%s4415_s20 + $0x18] sm:$0xff]  }
 0xf1a   : > { %v3202_v21 = vpop.f32.mrf.mxu1 }
 0xf1b   : > { %3209 = vmatmul.mubr.msk.bf16.vlgmr.msra.gmra.mxu0 %vm970_vm3, %v2055_v20 }
 0xf1c   : > { %v2052_v22 = vpop.f32.mrf.mxu1  ;;  %3220 = vmatprep.mubr.msk.bf16.mxu0 %vm3835_vm2, %v3834_v0 }
 0xf1e   : > { %v3203_v23 = vpop.f32.mrf.mxu1 }
 0xf20   : > { %v2144_v32 = vpop.f32.mrf.mxu1 }
 0xf21   : > { %v2150_v24 = vsel %vm1017_vm4, %v2144_v32, -inf }
 0xf22   : > { %2151 = vmax.xlane.f32.xlu0 %v2150_v24  ;;  %v3216_v25 = vpop.f32.mrf.mxu1 }
 0xf23   : > { %v2288_v25 = vsub.s32 2, %v4098_v2 }
 0xf24   : > { %v2147_v29 = vpop.f32.mrf.mxu1 }
 0xf26   : > { %v3217_v30 = vpop.f32.mrf.mxu1 }
 0xf38   : > { %2162 = vrot.lane.b32.xlu0 %v4309_v43, %s3838_s12 }
 0xfab   : > { %v2152_v33 = vpop.xlane.xlu0 %2151 }
 0xfac   : > { %v2153_v28 = vsub.f32 %v2144_v32, %v2152_v33  ;;  %v4430_v33 = vld [vmem:[%s4100_s25] sm:$0xff] }
 0xfae   : > { %v2154_v6 = vmul.f32 1.442695, %v2153_v28  ;;  %v2289_v28 = vrot.slane %v4430_v33, %v2288_v25 }
 0xfaf   : > { %v2163_v49 = vpop.permute.xlu0 %2162 }
 0xfb0   : > { %3512 = vpow2.f32 %v2154_v6  ;;  %v2168_v31 = vsel %vm1034_vm5, %v2163_v49, 0  ;;  %v2294_v6 = vsub.s32 3, %v4098_v2 }
 0xfb1   : > { %3219 = vmatpush3.bf16.msra.mxu0 %v2168_v31 }
 0xfb2   : > { %3232 = vmatprep.subr.bf16.mxu0 %v3834_v0 }
 0xfbd   : > { %v3513_v34 = vpop.eup %3512 }
 0xfbe   : > { %v2156_v43 = vsel %vm1017_vm4, %v3513_v34, 0.0 }
 0xfbf   : > { %2157 = vadd.xlane.f32.xlu1 %v2156_v43 }
 0xfc3   : > { %2263 = vadd.xlane.f32.xlu1 %v2261_v37 }
 0xfdb   : > { %v2093_v38 = vpop.f32.mrf.mxu0 }
 0xfdc   : > { %v2099_v12 = vadd.f32 %v2093_v38, %v4357_v51  ;;  %v3481_v38 = vld [vmem:[%s4415_s20 + $0x10] sm:$0xff]  }
 0xfdd   : > { %v3210_v39 = vpop.f32.mrf.mxu0 }
 0xfde   : > { %v3483_v39 = vld [vmem:[%s4415_s20] sm:$0xff]  }
 0xfdf   : > { %v2096_v40 = vpop.f32.mrf.mxu0 }
 0xfe0   : > { %v2301_v40 = vsub.s32 4, %v4098_v2 }
 0xfe1   : > { %v3211_v41 = vpop.f32.mrf.mxu0 }
 0xfe2   : > { %v2302_v41 = vrot.slane %v4430_v33, %v2301_v40 }
0x1048   : > { %v2158_v42 = vpop.xlane.xlu1 %2157 }
0x1049   : > { %3514 = vrcp.f32 %v2158_v42 }
0x104c   : > { %v2264_v17 = vpop.xlane.xlu1 %2263 }
0x104d   : > { %v2268_v44 = vmul.f32 0.0078125, %v2264_v17 }
0x104f   : > { %v4395_v45 = vsub.f32 %v2261_v37, %v2268_v44 }
0x1051   : > { %v2272_v61 = vmul.f32 %v4395_v45, %v4395_v45 }
0x1053   : > { %2274 = vadd.xlane.f32.xlu0 %v2272_v61 }
0x1056   : > { %v3515_v5 = vpop.eup %3514 }
0x1057   : > { %v2160_v19 = vmul.f32 %v3515_v5, %v3513_v34  ;;  %v2295_v34 = vrot.slane %v4430_v33, %v2294_v6 }
0x1059   : > { %v2161_v46 = vpack.c.bf16 %v2160_v19, %v2160_v19 }
0x105b   : > { %3221 = vmatmul.mubr.msk.bf16.vlgmr.msra.gmra.mxu0 %vm1017_vm4, %v2161_v46 }
0x105c   : > { %3248 = vmatprep.mubr.msk.bf16.mxu0 %vm3835_vm2, %v3834_v0  ;;  %3233 = vmatpush3.bf16.msra.mxu0 %v3468_v58 }
0x105d   : > { %3234 = vmatprep.subr.bf16.mxu0 %v3834_v0 }
0x1060   : > { %3235 = vmatpush3.bf16.msra.mxu0 %v3469_v16 }
0x1061   : > { %3236 = vmatprep.subr.bf16.mxu0 %v3834_v0 }
0x1064   : > { %3237 = vmatpush3.bf16.msra.mxu0 %v3470_v1 }
0x1065   : > { %3238 = vmatprep.subr.bf16.mxu0 %v3834_v0 }
0x10dc   : > { %v2275_v20 = vpop.xlane.xlu0 %2274 }
0x10dd   : > { %v2278_v21 = vmul.f32 0.0078125, %v2275_v20 }
0x10df   : > { %v2280_v22 = vadd.f32 1e-05, %v2278_v21 }
0x10e1   : > { %3516 = vrsqrt.f32 %v2280_v22 }
0x10ee   : > { %v3517_v29 = vpop.eup %3516 }
0x10ef   : > { %v2284_v30 = vmul.f32 %v3517_v29, %v4395_v45 }
0x10f1   : > { %v2290_v14 = vmul.f32 %v2289_v28, %v2284_v30 }
0x111b   : > { %v2204_v3 = vpop.f32.mrf.mxu0 }
0x111c   : > { %v2210_v47 = vpack.c.bf16 %v2204_v3, %v2204_v3 }
0x111d   : > { %v3222_v4 = vpop.f32.mrf.mxu0 }
0x111e   : > { %3229 = vmatmul.mubr.msk.bf16.vlgmr.msra.gmra.mxu1 %vm970_vm3, %v2210_v47  ;;  %v2397_v47 = vsub.s32 5, %v4098_v2 }
0x111f   : > { %v2207_v48 = vpop.f32.mrf.mxu0  ;;  %3268 = vmatprep.mubr.msk.bf16.mxu1 %vm3835_vm2, %v3834_v0  ;;  %3253 = vmatpush3.bf16.msra.mxu1 %v3476_v10  ;;  %v2514_v10 = vsub.s32 6, %v4098_v2 }
0x1120   : > { %3254 = vmatprep.subr.bf16.mxu1 %v3834_v0 }
0x1121   : > { %v3223_v51 = vpop.f32.mrf.mxu0 }
0x1123   : > { %3255 = vmatpush3.bf16.msra.mxu1 %v3477_v11  ;;  %v2520_v11 = vsub.s32 7, %v4098_v2 }
0x1124   : > { %3256 = vmatprep.subr.bf16.mxu1 %v3834_v0 }
0x1127   : > { %3257 = vmatpush3.bf16.msra.mxu1 %v3478_v15  ;;  %v2515_v15 = vrot.slane %v4430_v33, %v2514_v10 }
0x1128   : > { %3258 = vmatprep.subr.bf16.mxu1 %v3834_v0 }
0x112b   : > { %3259 = vmatpush3.bf16.msra.mxu1 %v3479_v18 }
0x112c   : > { %3260 = vmatprep.subr.bf16.mxu1 %v3834_v0 }
0x112f   : > { %3261 = vmatpush3.bf16.msra.mxu1 %v3480_v26  ;;  %v2521_v26 = vrot.slane %v4430_v33, %v2520_v11 }
0x1130   : > { %3262 = vmatprep.subr.bf16.mxu1 %v3834_v0 }
0x1133   : > { %3263 = vmatpush3.bf16.msra.mxu1 %v3481_v38 }
0x1134   : > { %3264 = vmatprep.subr.bf16.mxu1 %v3834_v0 }
0x11de   : > { %v2248_v50 = vpop.f32.mrf.mxu1 }
0x11df   : > { %v2254_v52 = vadd.f32 %v2248_v50, %v2099_v12  ;;  %v3482_v12 = vld [vmem:[%s4415_s20 + $0x8] sm:$0xff]  }
0x11e0   : > { %v3230_v53 = vpop.f32.mrf.mxu1  ;;  %3265 = vmatpush3.bf16.msra.mxu1 %v3482_v12 }
0x11e1   : > { %v2256_v54 = vadd.f32 %v2254_v52, %v4087_v62  ;;  %v3471_v62 = vld [vmem:[%s708_s15 + $0x20] sm:$0xff]   ;;  %3266 = vmatprep.subr.bf16.mxu1 %v3834_v0 }
0x11e2   : > { %v2251_v55 = vpop.f32.mrf.mxu1  ;;  %3239 = vmatpush3.bf16.msra.mxu0 %v3471_v62 }
0x11e3   : > { %v2262_v56 = vadd.f32 %v2260_v36, %v2256_v54  ;;  %3240 = vmatprep.subr.bf16.mxu0 %v3834_v0  ;;  %v2296_v36 = vadd.f32 %v2295_v34, %v2290_v14 }
0x11e4   : > { %v3231_v57 = vpop.f32.mrf.mxu1  ;;  %3267 = vmatpush3.bf16.msra.mxu1 %v3483_v39 }
0x11e5   : > { %2265 = vadd.xlane.f32.xlu1 %v2262_v56 }
0x11e6   : > { %3241 = vmatpush3.bf16.msra.mxu0 %v3472_v7 }
0x11e7   : > { %3242 = vmatprep.subr.bf16.mxu0 %v3834_v0 }
0x11ea   : > { %3243 = vmatpush3.bf16.msra.mxu0 %v3473_v8 }
0x11eb   : > { %3244 = vmatprep.subr.bf16.mxu0 %v3834_v0 }
0x11ee   : > { %3245 = vmatpush3.bf16.msra.mxu0 %v3474_v27 }
0x11ef   : > { %3246 = vmatprep.subr.bf16.mxu0 %v3834_v0  ;;  %v2398_v0 = vrot.slane %v4430_v33, %v2397_v47 }
0x11f2   : > { %3247 = vmatpush3.bf16.msra.mxu0 %v3475_v9 }
0x126e   : > { %v2266_v59 = vpop.xlane.xlu1 %2265 }
0x126f   : > { %v2269_v60 = vmul.f32 0.0078125, %v2266_v59 }
0x1271   : > { %v2271_v13 = vsub.f32 %v2262_v56, %v2269_v60 }
0x1273   : > { %v2273_v63 = vmul.f32 %v2271_v13, %v2271_v13 }
0x1275   : > { %2276 = vadd.xlane.f32.xlu1 %v2273_v63 }
0x12fe   : > { %v2277_v23 = vpop.xlane.xlu1 %2276 }
0x12ff   : > { %v2279_v32 = vmul.f32 0.0078125, %v2277_v23 }
0x1301   : > { %v2281_v24 = vadd.f32 1e-05, %v2279_v32 }
0x1303   : > { %3518 = vrsqrt.f32 %v2281_v24 }
0x1310   : > { %v3519_v49 = vpop.eup %3518 }
0x1311   : > { %v2285_v31 = vmul.f32 %v3519_v49, %v2271_v13 }
0x1313   : > { %v2291_v35 = vmul.f32 %v2289_v28, %v2285_v31 }
0x1315   : > { %v2297_v43 = vadd.f32 %v2295_v34, %v2291_v35 }
0x1317   : > { %v2298_v37 = vpack.c.bf16 %v2297_v43, %v2296_v36 }
0x1319   : > { %3249 = vmatmul.mubr.bf16.vlgmr.msra.gmra.mxu0 %v2298_v37 }
0x13d9   : > { %v2385_v42 = vpop.f32.mrf.mxu0 }
0x13da   : > { %v2386_v44 = vadd.f32 %v2385_v42, %v2302_v41 }
0x13db   : > { %v3250_v17 = vpop.f32.mrf.mxu0 }
0x13dc   : > { %v2392_v19 = vmax.f32 %v2386_v44, 0.0 }
0x13dd   : > { %v2388_v45 = vpop.f32.mrf.mxu0 }
0x13de   : > { %v2389_v61 = vadd.f32 %v2388_v45, %v2302_v41 }
0x13df   : > { %v3251_v5 = vpop.f32.mrf.mxu0 }
0x13e0   : > { %v2393_v46 = vmax.f32 %v2389_v61, 0.0 }
0x13e2   : > { %v2394_v3 = vpack.c.bf16 %v2393_v46, %v2392_v19 }
0x13e4   : > { %3269 = vmatmul.mubr.bf16.vlgmr.msra.gmra.mxu1 %v2394_v3 }
0x14a4   : > { %v2481_v4 = vpop.f32.mrf.mxu1 }
0x14a5   : > { %v2482_v48 = vadd.f32 %v2481_v4, %v2398_v0 }
0x14a6   : > { %v3270_v51 = vpop.f32.mrf.mxu1 }
0x14a7   : > { %v2488_v50 = vadd.f32 %v2482_v48, %v2296_v36 }
0x14a8   : > { %v2484_v52 = vpop.f32.mrf.mxu1 }
0x14a9   : > { %v2485_v53 = vadd.f32 %v2484_v52, %v2398_v0  ;;  %2490 = vadd.xlane.f32.xlu1 %v2488_v50 }
0x14aa   : > { %v3271_v54 = vpop.f32.mrf.mxu1 }
0x14ab   : > { %v2489_v55 = vadd.f32 %v2485_v53, %v2297_v43 }
0x14ad   : > { %2492 = vadd.xlane.f32.xlu1 %v2489_v55 }
0x1532   : > { %v2491_v56 = vpop.xlane.xlu1 %2490 }
0x1533   : > { %v2494_v57 = vmul.f32 0.0078125, %v2491_v56 }
0x1535   : > { %v2496_v58 = vsub.f32 %v2488_v50, %v2494_v57 }
0x1536   : > { %v2493_v16 = vpop.xlane.xlu1 %2492 }
0x1537   : > { %v2495_v59 = vmul.f32 0.0078125, %v2493_v16  ;;  %v2498_v60 = vmul.f32 %v2496_v58, %v2496_v58 }
0x1539   : > { %v2497_v13 = vsub.f32 %v2489_v55, %v2495_v59  ;;  %2500 = vadd.xlane.f32.xlu1 %v2498_v60 }
0x153b   : > { %v2499_v63 = vmul.f32 %v2497_v13, %v2497_v13 }
0x153d   : > { %2502 = vadd.xlane.f32.xlu1 %v2499_v63 }
0x15c2   : > { %v2501_v1 = vpop.xlane.xlu1 %2500 }
0x15c3   : > { %v2504_v62 = vmul.f32 0.0078125, %v2501_v1 }
0x15c5   : > { %v2506_v7 = vadd.f32 1e-05, %v2504_v62 }
0x15c6   : > { %v2503_v8 = vpop.xlane.xlu1 %2502 }
0x15c7   : > { %3520 = vrsqrt.f32 %v2506_v7  ;;  %v2505_v27 = vmul.f32 0.0078125, %v2503_v8 }
0x15c9   : > { %v2507_v9 = vadd.f32 1e-05, %v2505_v27 }
0x15cb   : > { %3522 = vrsqrt.f32 %v2507_v9 }
0x15d4   : > { %v3521_v18 = vpop.eup %3520 }
0x15d5   : > { %v2510_v20 = vmul.f32 %v3521_v18, %v2496_v58 }
0x15d7   : > { %v2516_v21 = vmul.f32 %v2515_v15, %v2510_v20 }
0x15d8   : > { %v3523_v22 = vpop.eup %3522 }
0x15d9   : > { %v2522_v23 = vadd.f32 %v2521_v26, %v2516_v21  ;;  %v2511_v32 = vmul.f32 %v3523_v22, %v2497_v13 }
0x15db   : > { %2524 = vst [vmem:[#allocation2] sm:$0xff] %v2522_v23  ;;  %v2517_v24 = vmul.f32 %v2515_v15, %v2511_v32  ;;  %2529 = sbr.rel (%p2933_p2) target bundleno = 5832 (0x16c8), region = 104 }
0x15dd   : > { %v2523_v25 = vadd.f32 %v2521_v26, %v2517_v24 }
0x15df   : > { %2525 = vst [vmem:[#allocation2 + $0x8] sm:$0xff] %v2523_v25 }
0x15e0   : > { %v3525_v29 = vld [vmem:[#allocation8 + $0x38] sm:$0xff]   ;;  %v3839_v30 = vmov 0.0   ;;  %v3526_v2 = vld [vmem:[#allocation8 + $0x30] sm:$0xff]   ;;  %vm3840_vm6 = vmmov 0   ;;  %v2530_v33 = vrot.slane %v2522_v23, 4  ;;  %v2536_v28 = vrot.slane %v2523_v25, 4 }
0x15e1   : > { %3272 = vmatprep.subr.bf16.mxu0 %v3839_v30  ;;  %3288 = vmatprep.mubr.msk.bf16.mxu0 %vm3840_vm6, %v3839_v30  ;;  %v3527_v31 = vld [vmem:[#allocation8 + $0x28] sm:$0xff]   ;;  %v3528_v43 = vld [vmem:[#allocation8 + $0x20] sm:$0xff]   ;;  %v3529_v40 = vld [vmem:[#allocation8 + $0x18] sm:$0xff]   ;;  %vm2572_vm7 = vcmask 1041409  }
0x15e2   : > { %3273 = vmatpush3.bf16.msra.mxu0 %v3525_v29  ;;  %v2531_v6 = vadd.f32 %v2530_v33, %v2522_v23  ;;  %v2537_v49 = vadd.f32 %v2536_v28, %v2523_v25  ;;  %v3530_v17 = vld [vmem:[#allocation8 + $0x10] sm:$0xff]   ;;  %v3531_v61 = vld [vmem:[#allocation8 + $0x8] sm:$0xff]   ;;  %v3532_v46 = vld [vmem:[#allocation8] sm:$0xff]  }
0x15e3   : > { %3274 = vmatprep.subr.bf16.mxu0 %v3839_v30  ;;  %v2934_v0 = vld [vmem:[%s4483_s5 + $0x2] ss:$0 sm:$0xff] }
0x15e4   : > { %v2532_v14 = vrot.slane %v2531_v6, 2  ;;  %v2538_v34 = vrot.slane %v2537_v49, 2 }
0x15e6   : > { %3275 = vmatpush3.bf16.msra.mxu0 %v3526_v2  ;;  %v2533_v35 = vadd.f32 %v2532_v14, %v2531_v6  ;;  %v2539_v36 = vadd.f32 %v2538_v34, %v2537_v49 }
0x15e7   : > { %3276 = vmatprep.subr.bf16.mxu0 %v3839_v30 }
0x15e8   : > { %v2534_v37 = vrot.slane %v2533_v35, 1  ;;  %v2540_v38 = vrot.slane %v2539_v36, 1 }
0x15ea   : > { %3277 = vmatpush3.bf16.msra.mxu0 %v3527_v31  ;;  %v2535_v12 = vadd.f32 %v2534_v37, %v2533_v35  ;;  %v2541_v39 = vadd.f32 %v2540_v38, %v2539_v36 }
0x15eb   : > { %3278 = vmatprep.subr.bf16.mxu0 %v3839_v30 }
0x15ec   : > { %v2543_v41 = vmul.f32 0.125, %v2535_v12  ;;  %v2544_v42 = vmul.f32 0.125, %v2541_v39 }
0x15ee   : > { %3279 = vmatpush3.bf16.msra.mxu0 %v3528_v43  ;;  %v2561_v44 = vpack.c.bf16 %v2543_v41, %v2543_v41  ;;  %v2562_v45 = vpack.c.bf16 %v2544_v42, %v2544_v42 }
0x15ef   : > { %3280 = vmatprep.subr.bf16.mxu0 %v3839_v30 }
0x15f0   : > { %v2570_v5 = vunpack.c.l.b16 %v2561_v44  ;;  %v2571_v19 = vunpack.c.l.b16 %v2562_v45 }
0x15f2   : > { %3281 = vmatpush3.bf16.msra.mxu0 %v3529_v40  ;;  %v2573_v3 = vsel %vm2572_vm7, %v2571_v19, %v2570_v5 }
0x15f3   : > { %3282 = vmatprep.subr.bf16.mxu0 %v3839_v30  ;;  %v2574_v47 = vpack.c.b16 %v2573_v3, %v2573_v3 }
0x15f6   : > { %3283 = vmatpush3.bf16.msra.mxu0 %v3530_v17 }
0x15f7   : > { %3284 = vmatprep.subr.bf16.mxu0 %v3839_v30 }
0x15fa   : > { %3285 = vmatpush3.bf16.msra.mxu0 %v3531_v61 }
0x15fb   : > { %3286 = vmatprep.subr.bf16.mxu0 %v3839_v30 }
0x15fe   : > { %3287 = vmatpush3.bf16.msra.mxu0 %v3532_v46 }
0x1601   : > { %3289 = vmatmul.mubr.bf16.vlgmr.msra.gmra.mxu0 %v2574_v47 }
0x16c1   : > { %v2658_v4 = vpop.f32.mrf.mxu0 }
0x16c2   : > { %v2659_v48 = vadd.f32 %v2934_v0, %v2658_v4 }
0x16c3   : > { %v3290_v51 = vpop.f32.mrf.mxu0 }
0x16c4   : > { %2664 = vst [vmem:[#allocation17] sm:$0x3] %v2659_v48 }
0x16c5   : > { %v2661_v50 = vpop.f32.mrf.mxu0 }
0x16c7   : > { %v3291_v52 = vpop.f32.mrf.mxu0 }
0x16c8 PF: > { %s4501_s28 = sadd.s32 4294967295, %s3811_s19   ;;  %s3841_s22 = smov [#allocation17]  }
0x16c9   : > { %p4454_p5 = scmp.eq.s32.totalorder %s4501_s28, 1  ;;  %s2674_s14 = sshll.u32 %s3841_s22, 4  ;;  %s2675_s14 = int_to_ptr.vmem [resolvable:$true] %s2674_s14 }
0x16ca   : > { %s3741_s29 = scalar_lea.vmem %s2675_s14, 32  ;;  %p3748_p4 = scmp.lt.s32.totalorder %s2675_s14, %s2675_s14 }
0x16cb   : > { %p3742_p6 = scmp.ne.s32.totalorder %s2675_s14, %s3741_s29  ;;  %p3749_p7 = scmp.lt.s32.totalorder %s3741_s29, %s3741_s29 }
0x16cd   : > { %p3743_p0 = pnand %p3742_p6, %p4454_p5  ;;  %p3750_p8 = por %p3749_p7, %p3748_p4 }
0x16cf   : > { %p3744_p1 = pneg %p3743_p0 }
0x16d1   : > { %p3751_p9 = pnand %p3750_p8, %p3744_p1 }
0x16d3   : > { %3754 = shalt.err (!%p3751_p9)
}
0x16d4   : > { %3325 = dma.vmem_to_hbm [thread:$0]  (%p4454_p5), %s2675_s14, 32, %s4489_s11, [#allocation5]  }
0x16d5   : > { %3798 = dma.done.wait (%p4454_p5), [#allocation5], 32  }
0x16d6   : > { %3800 = vsyncadd (%p4454_p5), [#allocation5], 4294967264 }
0x16d7 PF: > { %s27_s19 = sadd.s32 1, %s3811_s19   ;;  %s4503_s17 = smov %s3807_s18 }
0x16d8   : > { %p24_p10 = scmp.ge.s32.totalorder %s27_s19, 4   ;;  %s4504_s18 = smov %s4506_s26 }
0x16da   :  { %26 = sbr.rel (!%p24_p10) target bundleno = 7 (0x7), region = 141 }
0x16df   :  { %2687 = vsyncpa [#allocation4], 1 }
0x16e0   :  { %2689 = vsyncpa [#allocation4 + $0x1], 1 }
0x16e1   :  { %2690 = vsyncpa [#allocation7], 1 }
0x16e2   :  { %2691 = vsyncpa [#allocation10], 1 }
0x16e3   :  { %2692 = vsyncpa [#allocation13], 1 }
0x16e4   :  { %2693 = vsyncpa [#allocation16], 1 }
0x16e5   :  { %2694 = vsyncpa [#allocation5], 1 }
0x16e6   :  { %2696 = vsyncpa [#allocation5 + $0x1], 1 }

</bundles_post_ra>
